<compile_context>
chip_gen: v7x
topology: tpu7x:2x2x1
jax: 0.10.0
libtpu: 0.0.40
codegen_flags: <defaults>
</compile_context>

<pallas_src>
import functools
import math

import jax
import jax.numpy as jnp
from jax.experimental import pallas as pl
from jax.experimental.pallas import tpu as pltpu

BN_EPS = 1e-5
LANE = 128


def conv_stats_kernel(x_ref, w_ref, y_ref, stat_ref, *, h, w):
    """3x3 / stride-1 conv for one sample + partial BN statistics.

    x_ref:    (H+2, W+2, Cin)     bf16 zero-padded halo slab (one sample)
    w_ref:    (9, Cin, Cout_pad)  bf16 weights, tap-major (dy*3+dx)
    y_ref:    (H*W, Cout_pad)     f32 conv output (pre-BN) for this sample
    stat_ref: (2, Cout_pad)       f32 [sum(y), sum(y*y)] for this grid step
    """
    # Upcast the slab once; slicing / reshaping happens on the f32 value (the
    # most robust Mosaic path), the matmul operands are cast back to bf16 so
    # the MXU runs the narrow path with an f32 accumulator.
    xs = x_ref[...].astype(jnp.float32)
    cin = xs.shape[-1]

    acc = jnp.zeros(y_ref.shape, jnp.float32)
    for dy in range(3):                         # unrolled 3x3 taps
        for dx in range(3):
            patch = xs[dy:dy + h, dx:dx + w, :].reshape(h * w, cin)
            acc = acc + jnp.dot(patch.astype(jnp.bfloat16),
                                w_ref[dy * 3 + dx],
                                preferred_element_type=jnp.float32)
    y_ref[...] = acc

    # Partial statistics for this grid step, written with a single store.
    s1 = jnp.sum(acc, axis=0, keepdims=True)
    s2 = jnp.sum(acc * acc, axis=0, keepdims=True)
    stat_ref[...] = jnp.concatenate([s1, s2], axis=0)


def bn_apply_kernel(y_ref, scale_ref, shift_ref, o_ref):
    """Fused per-channel affine: o = y * scale + shift (in place via alias)."""
    o_ref[...] = y_ref[...] * scale_ref[...] + shift_ref[...]


def convbn_forward(x_nchw, w_oihw, gamma, beta, *, eps=BN_EPS):
    n, cin, h, w = x_nchw.shape
    cout, cin_w, kh, kw = w_oihw.shape
    assert cin_w == cin and kh == 3 and kw == 3, "ConvBn spec is 3x3, pad=1"
    # TODO(synk): pad the row count for spatial sizes where H*W % 8 != 0.
    assert (h * w) % 8 == 0, "per-sample pixel count must be sublane aligned"

    cpad = pl.cdiv(cout, LANE) * LANE           # lane-dense output channels
    m_total = n * h * w

    # ---- host-side layout: NCHW -> NHWC, 1px halo pad, bf16 MXU operands ---
    # TODO(synk): accept/produce NHWC directly (or fold the transpose into the
    # halo DMA) when the surrounding graph allows; each transpose is an extra
    # HBM read+write of the activation tensor in XLA.
    x_nhwc = jnp.transpose(x_nchw, (0, 2, 3, 1))
    xpad = jnp.pad(x_nhwc, ((0, 0), (1, 1), (1, 1), (0, 0))).astype(jnp.bfloat16)

    # (O, I, KH, KW) -> (KH, KW, I, O) -> (9, Cin, Cout_pad), tap-major.
    w_taps = jnp.transpose(w_oihw, (2, 3, 1, 0)).reshape(9, cin, cout)
    w_taps = jnp.pad(w_taps, ((0, 0), (0, 0), (0, cpad - cout))).astype(jnp.bfloat16)

    # -------- pass 1: conv (9 accumulating K=Cin matmuls) + partial stats ----
    step_bytes = ((h + 2) * (w + 2) * cin * 2 + 9 * cin * cpad * 2
                  + h * w * cpad * 4 + 2 * cpad * 4)
    vmem1 = int(min(96 * 2**20, max(32 * 2**20, 4 * step_bytes)))
    flops1 = 2 * m_total * 9 * cin * cpad
    bytes1 = xpad.size * 2 + w_taps.size * 2 + m_total * cpad * 4 + n * 2 * cpad * 4

    y, stats = pl.pallas_call(
        functools.partial(conv_stats_kernel, h=h, w=w),
        out_shape=(jax.ShapeDtypeStruct((m_total, cpad), jnp.float32),
                   jax.ShapeDtypeStruct((n, 2, cpad), jnp.float32)),
        grid_spec=pltpu.PrefetchScalarGridSpec(
            num_scalar_prefetch=0,
            grid=(n,),                                   # one step per sample
            in_specs=[
                pl.BlockSpec((None, h + 2, w + 2, cin), lambda b: (b, 0, 0, 0)),
                # TODO(synk): pipeline_mode=pl.Buffered(1) to single-buffer the
                # resident weight block on VMEM-tight chips (v7x, large Cin).
                pl.BlockSpec((9, cin, cpad), lambda b: (0, 0, 0)),
            ],
            out_specs=[
                pl.BlockSpec((h * w, cpad), lambda b: (b, 0)),
                pl.BlockSpec((None, 2, cpad), lambda b: (b, 0, 0)),
            ],
        ),
        compiler_params=pltpu.CompilerParams(
            dimension_semantics=("parallel",),
            vmem_limit_bytes=vmem1),
        cost_estimate=pl.CostEstimate(
            flops=flops1, transcendentals=0, bytes_accessed=bytes1),
    )(xpad, w_taps)

    # ---- BN stats reduction -> fused scale/shift (tiny, done outside) -------
    # TODO(synk): E[y^2]-mean^2 can cancel when |mean| >> std; a centered second
    # pass over the stored y (cheap now that y is kept) would be more robust.
    sum_y = jnp.sum(stats[:, 0, :], axis=0)
    sum_y2 = jnp.sum(stats[:, 1, :], axis=0)
    mean = sum_y / m_total
    var = jnp.maximum(sum_y2 / m_total - mean * mean, 0.0)   # biased variance
    inv_std = jax.lax.rsqrt(var + eps)
    gamma_p = jnp.pad(gamma.astype(jnp.float32), (0, cpad - cout))
    beta_p = jnp.pad(beta.astype(jnp.float32), (0, cpad - cout))
    scale = (gamma_p * inv_std).reshape(1, cpad)
    shift = (beta_p - mean * gamma_p * inv_std).reshape(1, cpad)

    # -------- pass 2: in-place normalize (reads y back, no GEMM recompute) ---
    # TODO(synk): per-generation tile_m sweep (cap ~512-768 on v7x's 64 MiB VMEM).
    tile_m = m_total
    for cand in (1024, 512, 256, 128, 64, 32, 16, 8):
        if m_total % cand == 0:
            tile_m = cand
            break
    n_tiles = m_total // tile_m
    vmem2 = int(min(96 * 2**20, max(32 * 2**20, 6 * tile_m * cpad * 4)))

    out = pl.pallas_call(
        bn_apply_kernel,
        out_shape=jax.ShapeDtypeStruct((m_total, cpad), jnp.float32),
        grid_spec=pltpu.PrefetchScalarGridSpec(
            num_scalar_prefetch=0,
            grid=(n_tiles,),
            in_specs=[
                pl.BlockSpec((tile_m, cpad), lambda i: (i, 0)),
                pl.BlockSpec((1, cpad), lambda i: (0, 0)),
                pl.BlockSpec((1, cpad), lambda i: (0, 0)),
            ],
            out_specs=pl.BlockSpec((tile_m, cpad), lambda i: (i, 0)),
        ),
        input_output_aliases={0: 0},             # normalize y in place
        compiler_params=pltpu.CompilerParams(
            dimension_semantics=("parallel",),
            vmem_limit_bytes=vmem2),
        cost_estimate=pl.CostEstimate(
            flops=2 * m_total * cpad, transcendentals=0,
            bytes_accessed=2 * m_total * cpad * 4),
    )(y, scale, shift)

    out = out[:, :cout].reshape(n, h, w, cout)
    return jnp.transpose(out, (0, 3, 1, 2))                  # back to NCHW


def convbn_reference(x_nchw, w_oihw, gamma, beta, eps=BN_EPS):
    """Pure-JAX reference mirroring PyTorch ConvBn (training-mode BN)."""
    y = jax.lax.conv_general_dilated(
        x_nchw.astype(jnp.float32), w_oihw.astype(jnp.float32),
        window_strides=(1, 1), padding=((1, 1), (1, 1)),
        dimension_numbers=("NCHW", "OIHW", "NCHW"),
        precision=jax.lax.Precision.HIGHEST)
    mean = jnp.mean(y, axis=(0, 2, 3), keepdims=True)
    var = jnp.mean(jnp.square(y - mean), axis=(0, 2, 3), keepdims=True)
    y_hat = (y - mean) * jax.lax.rsqrt(var + eps)
    return y_hat * gamma.reshape(1, -1, 1, 1) + beta.reshape(1, -1, 1, 1)


if __name__ == "__main__":
    key = jax.random.PRNGKey(0)
    kx, kw, kg, kb = jax.random.split(key, 4)

    n, cin, cout, h, w = 2, 4, 8, 16, 16
    x = jax.random.normal(kx, (n, cin, h, w), jnp.float32)
    fan_in = cin * 3 * 3
    conv_w = jax.random.normal(kw, (cout, cin, 3, 3), jnp.float32) / math.sqrt(fan_in)
    # PyTorch BN defaults are gamma=1, beta=0; use non-trivial values so the
    # affine path is actually exercised (reference uses the same values).
    gamma = 1.0 + 0.5 * jax.random.normal(kg, (cout,), jnp.float32)
    beta = 0.1 * jax.random.normal(kb, (cout,), jnp.float32)

    fwd = jax.jit(convbn_forward)
    out = jax.block_until_ready(fwd(x, conv_w, gamma, beta))

    ref = convbn_reference(x, conv_w, gamma, beta)
    assert out.shape == (n, cout, h, w), out.shape
    assert bool(jnp.all(jnp.isfinite(out)))
    max_err = float(jnp.max(jnp.abs(out - ref)))
    # bf16 MXU operands with f32 accumulation / f32 BN epilogue.
    assert jnp.allclose(out, ref, rtol=2e-2, atol=2e-2), max_err

    print("KERNEL_OK")
</pallas_src>

<mosaic_0001>
module attributes {stable_mosaic.version = 11 : i64} {
  func.func @conv_stats_kernel(%arg0: i32, %arg1: memref<1x18x18x4xbf16, #tpu.memory_space<vmem>>, %arg2: memref<9x4x128xbf16, #tpu.memory_space<vmem>>, %arg3: memref<256x128xf32, #tpu.memory_space<vmem>>, %arg4: memref<1x2x128xf32, #tpu.memory_space<vmem>>) attributes {dimension_semantics = [#tpu.dimension_semantics<parallel>], iteration_bounds = array<i64: 2>, scalar_prefetch = 0 : i64, scratch_operands = 0 : i64, tpu.core_type = #tpu.core_type<tc>, window_params = [{transform_indices = @transform_0, window_bounds = array<i64: 1, 18, 18, 4>}, {pipeline_mode = #tpu.pipeline_mode<synchronous>, transform_indices = @transform_1, window_bounds = array<i64: 9, 4, 128>}, {transform_indices = @transform_2, window_bounds = array<i64: 256, 128>}, {transform_indices = @transform_3, window_bounds = array<i64: 1, 2, 128>}]} {
    %c0 = arith.constant 0 : index
    %c0_0 = arith.constant 0 : index
    %c0_1 = arith.constant 0 : index
    %c0_2 = arith.constant 0 : index
    %0 = vector.load %arg1[%c0, %c0_0, %c0_1, %c0_2] : memref<1x18x18x4xbf16, #tpu.memory_space<vmem>>, vector<1x18x18x4xbf16>
    %1 = vector.shape_cast %0 : vector<1x18x18x4xbf16> to vector<18x18x4xbf16>
    %2 = arith.extf %1 : vector<18x18x4xbf16> to vector<18x18x4xf32>
    %cst = arith.constant 0.000000e+00 : f32
    %3 = vector.broadcast %cst : f32 to vector<256x128xf32>
    %4 = vector.extract_strided_slice %2 {offsets = [0, 0, 0], sizes = [16, 16, 4], strides = [1, 1, 1]} : vector<18x18x4xf32> to vector<16x16x4xf32>
    %5 = vector.shape_cast %4 : vector<16x16x4xf32> to vector<256x4xf32>
    %6 = arith.truncf %5 : vector<256x4xf32> to vector<256x4xbf16>
    %c0_3 = arith.constant 0 : index
    %c0_4 = arith.constant 0 : index
    %c0_5 = arith.constant 0 : index
    %7 = vector.load %arg2[%c0_3, %c0_4, %c0_5] : memref<9x4x128xbf16, #tpu.memory_space<vmem>>, vector<1x4x128xbf16>
    %8 = vector.shape_cast %7 : vector<1x4x128xbf16> to vector<4x128xbf16>
    %cst_6 = arith.constant dense<0.000000e+00> : vector<256x128xf32>
    %9 = tpu.matmul %6, %8, %cst_6 {dimension_numbers = #tpu.dot_dimension_numbers<[1], [0], [0], [1], [0, 0, 1, 1], [], []>} : vector<256x4xbf16>, vector<4x128xbf16>, vector<256x128xf32> -> vector<256x128xf32>
    %10 = arith.addf %3, %9 : vector<256x128xf32>
    %11 = vector.extract_strided_slice %2 {offsets = [0, 1, 0], sizes = [16, 16, 4], strides = [1, 1, 1]} : vector<18x18x4xf32> to vector<16x16x4xf32>
    %12 = vector.shape_cast %11 : vector<16x16x4xf32> to vector<256x4xf32>
    %13 = arith.truncf %12 : vector<256x4xf32> to vector<256x4xbf16>
    %c1 = arith.constant 1 : index
    %c0_7 = arith.constant 0 : index
    %c0_8 = arith.constant 0 : index
    %14 = vector.load %arg2[%c1, %c0_7, %c0_8] : memref<9x4x128xbf16, #tpu.memory_space<vmem>>, vector<1x4x128xbf16>
    %15 = vector.shape_cast %14 : vector<1x4x128xbf16> to vector<4x128xbf16>
    %cst_9 = arith.constant dense<0.000000e+00> : vector<256x128xf32>
    %16 = tpu.matmul %13, %15, %cst_9 {dimension_numbers = #tpu.dot_dimension_numbers<[1], [0], [0], [1], [0, 0, 1, 1], [], []>} : vector<256x4xbf16>, vector<4x128xbf16>, vector<256x128xf32> -> vector<256x128xf32>
    %17 = arith.addf %10, %16 : vector<256x128xf32>
    %18 = vector.extract_strided_slice %2 {offsets = [0, 2, 0], sizes = [16, 16, 4], strides = [1, 1, 1]} : vector<18x18x4xf32> to vector<16x16x4xf32>
    %19 = vector.shape_cast %18 : vector<16x16x4xf32> to vector<256x4xf32>
    %20 = arith.truncf %19 : vector<256x4xf32> to vector<256x4xbf16>
    %c2 = arith.constant 2 : index
    %c0_10 = arith.constant 0 : index
    %c0_11 = arith.constant 0 : index
    %21 = vector.load %arg2[%c2, %c0_10, %c0_11] : memref<9x4x128xbf16, #tpu.memory_space<vmem>>, vector<1x4x128xbf16>
    %22 = vector.shape_cast %21 : vector<1x4x128xbf16> to vector<4x128xbf16>
    %cst_12 = arith.constant dense<0.000000e+00> : vector<256x128xf32>
    %23 = tpu.matmul %20, %22, %cst_12 {dimension_numbers = #tpu.dot_dimension_numbers<[1], [0], [0], [1], [0, 0, 1, 1], [], []>} : vector<256x4xbf16>, vector<4x128xbf16>, vector<256x128xf32> -> vector<256x128xf32>
    %24 = arith.addf %17, %23 : vector<256x128xf32>
    %25 = vector.extract_strided_slice %2 {offsets = [1, 0, 0], sizes = [16, 16, 4], strides = [1, 1, 1]} : vector<18x18x4xf32> to vector<16x16x4xf32>
    %26 = vector.shape_cast %25 : vector<16x16x4xf32> to vector<256x4xf32>
    %27 = arith.truncf %26 : vector<256x4xf32> to vector<256x4xbf16>
    %c3 = arith.constant 3 : index
    %c0_13 = arith.constant 0 : index
    %c0_14 = arith.constant 0 : index
    %28 = vector.load %arg2[%c3, %c0_13, %c0_14] : memref<9x4x128xbf16, #tpu.memory_space<vmem>>, vector<1x4x128xbf16>
    %29 = vector.shape_cast %28 : vector<1x4x128xbf16> to vector<4x128xbf16>
    %cst_15 = arith.constant dense<0.000000e+00> : vector<256x128xf32>
    %30 = tpu.matmul %27, %29, %cst_15 {dimension_numbers = #tpu.dot_dimension_numbers<[1], [0], [0], [1], [0, 0, 1, 1], [], []>} : vector<256x4xbf16>, vector<4x128xbf16>, vector<256x128xf32> -> vector<256x128xf32>
    %31 = arith.addf %24, %30 : vector<256x128xf32>
    %32 = vector.extract_strided_slice %2 {offsets = [1, 1, 0], sizes = [16, 16, 4], strides = [1, 1, 1]} : vector<18x18x4xf32> to vector<16x16x4xf32>
    %33 = vector.shape_cast %32 : vector<16x16x4xf32> to vector<256x4xf32>
    %34 = arith.truncf %33 : vector<256x4xf32> to vector<256x4xbf16>
    %c4 = arith.constant 4 : index
    %c0_16 = arith.constant 0 : index
    %c0_17 = arith.constant 0 : index
    %35 = vector.load %arg2[%c4, %c0_16, %c0_17] : memref<9x4x128xbf16, #tpu.memory_space<vmem>>, vector<1x4x128xbf16>
    %36 = vector.shape_cast %35 : vector<1x4x128xbf16> to vector<4x128xbf16>
    %cst_18 = arith.constant dense<0.000000e+00> : vector<256x128xf32>
    %37 = tpu.matmul %34, %36, %cst_18 {dimension_numbers = #tpu.dot_dimension_numbers<[1], [0], [0], [1], [0, 0, 1, 1], [], []>} : vector<256x4xbf16>, vector<4x128xbf16>, vector<256x128xf32> -> vector<256x128xf32>
    %38 = arith.addf %31, %37 : vector<256x128xf32>
    %39 = vector.extract_strided_slice %2 {offsets = [1, 2, 0], sizes = [16, 16, 4], strides = [1, 1, 1]} : vector<18x18x4xf32> to vector<16x16x4xf32>
    %40 = vector.shape_cast %39 : vector<16x16x4xf32> to vector<256x4xf32>
    %41 = arith.truncf %40 : vector<256x4xf32> to vector<256x4xbf16>
    %c5 = arith.constant 5 : index
    %c0_19 = arith.constant 0 : index
    %c0_20 = arith.constant 0 : index
    %42 = vector.load %arg2[%c5, %c0_19, %c0_20] : memref<9x4x128xbf16, #tpu.memory_space<vmem>>, vector<1x4x128xbf16>
    %43 = vector.shape_cast %42 : vector<1x4x128xbf16> to vector<4x128xbf16>
    %cst_21 = arith.constant dense<0.000000e+00> : vector<256x128xf32>
    %44 = tpu.matmul %41, %43, %cst_21 {dimension_numbers = #tpu.dot_dimension_numbers<[1], [0], [0], [1], [0, 0, 1, 1], [], []>} : vector<256x4xbf16>, vector<4x128xbf16>, vector<256x128xf32> -> vector<256x128xf32>
    %45 = arith.addf %38, %44 : vector<256x128xf32>
    %46 = vector.extract_strided_slice %2 {offsets = [2, 0, 0], sizes = [16, 16, 4], strides = [1, 1, 1]} : vector<18x18x4xf32> to vector<16x16x4xf32>
    %47 = vector.shape_cast %46 : vector<16x16x4xf32> to vector<256x4xf32>
    %48 = arith.truncf %47 : vector<256x4xf32> to vector<256x4xbf16>
    %c6 = arith.constant 6 : index
    %c0_22 = arith.constant 0 : index
    %c0_23 = arith.constant 0 : index
    %49 = vector.load %arg2[%c6, %c0_22, %c0_23] : memref<9x4x128xbf16, #tpu.memory_space<vmem>>, vector<1x4x128xbf16>
    %50 = vector.shape_cast %49 : vector<1x4x128xbf16> to vector<4x128xbf16>
    %cst_24 = arith.constant dense<0.000000e+00> : vector<256x128xf32>
    %51 = tpu.matmul %48, %50, %cst_24 {dimension_numbers = #tpu.dot_dimension_numbers<[1], [0], [0], [1], [0, 0, 1, 1], [], []>} : vector<256x4xbf16>, vector<4x128xbf16>, vector<256x128xf32> -> vector<256x128xf32>
    %52 = arith.addf %45, %51 : vector<256x128xf32>
    %53 = vector.extract_strided_slice %2 {offsets = [2, 1, 0], sizes = [16, 16, 4], strides = [1, 1, 1]} : vector<18x18x4xf32> to vector<16x16x4xf32>
    %54 = vector.shape_cast %53 : vector<16x16x4xf32> to vector<256x4xf32>
    %55 = arith.truncf %54 : vector<256x4xf32> to vector<256x4xbf16>
    %c7 = arith.constant 7 : index
    %c0_25 = arith.constant 0 : index
    %c0_26 = arith.constant 0 : index
    %56 = vector.load %arg2[%c7, %c0_25, %c0_26] : memref<9x4x128xbf16, #tpu.memory_space<vmem>>, vector<1x4x128xbf16>
    %57 = vector.shape_cast %56 : vector<1x4x128xbf16> to vector<4x128xbf16>
    %cst_27 = arith.constant dense<0.000000e+00> : vector<256x128xf32>
    %58 = tpu.matmul %55, %57, %cst_27 {dimension_numbers = #tpu.dot_dimension_numbers<[1], [0], [0], [1], [0, 0, 1, 1], [], []>} : vector<256x4xbf16>, vector<4x128xbf16>, vector<256x128xf32> -> vector<256x128xf32>
    %59 = arith.addf %52, %58 : vector<256x128xf32>
    %60 = vector.extract_strided_slice %2 {offsets = [2, 2, 0], sizes = [16, 16, 4], strides = [1, 1, 1]} : vector<18x18x4xf32> to vector<16x16x4xf32>
    %61 = vector.shape_cast %60 : vector<16x16x4xf32> to vector<256x4xf32>
    %62 = arith.truncf %61 : vector<256x4xf32> to vector<256x4xbf16>
    %c8 = arith.constant 8 : index
    %c0_28 = arith.constant 0 : index
    %c0_29 = arith.constant 0 : index
    %63 = vector.load %arg2[%c8, %c0_28, %c0_29] : memref<9x4x128xbf16, #tpu.memory_space<vmem>>, vector<1x4x128xbf16>
    %64 = vector.shape_cast %63 : vector<1x4x128xbf16> to vector<4x128xbf16>
    %cst_30 = arith.constant dense<0.000000e+00> : vector<256x128xf32>
    %65 = tpu.matmul %62, %64, %cst_30 {dimension_numbers = #tpu.dot_dimension_numbers<[1], [0], [0], [1], [0, 0, 1, 1], [], []>} : vector<256x4xbf16>, vector<4x128xbf16>, vector<256x128xf32> -> vector<256x128xf32>
    %66 = arith.addf %59, %65 : vector<256x128xf32>
    %c0_31 = arith.constant 0 : index
    %c0_32 = arith.constant 0 : index
    %67 = vector.load %arg3[%c0_31, %c0_32] : memref<256x128xf32, #tpu.memory_space<vmem>>, vector<256x128xf32>
    tpu.vector_store %arg3[%c0_31, %c0_32], %66 {strides = array<i32>} : memref<256x128xf32, #tpu.memory_space<vmem>>, vector<256x128xf32>,
    %cst_33 = arith.constant dense<0.000000e+00> : vector<128xf32>
    %68 = vector.multi_reduction <add>, %66, %cst_33 [0] : vector<256x128xf32> to vector<128xf32>
    %69 = vector.shape_cast %68 : vector<128xf32> to vector<1x128xf32>
    %70 = arith.mulf %66, %66 : vector<256x128xf32>
    %cst_34 = arith.constant dense<0.000000e+00> : vector<128xf32>
    %71 = vector.multi_reduction <add>, %70, %cst_34 [0] : vector<256x128xf32> to vector<128xf32>
    %72 = vector.shape_cast %71 : vector<128xf32> to vector<1x128xf32>
    %73 = tpu.concatenate %69, %72 in 0 : vector<1x128xf32>, vector<1x128xf32> -> vector<2x128xf32>
    %c0_35 = arith.constant 0 : index
    %c0_36 = arith.constant 0 : index
    %c0_37 = arith.constant 0 : index
    %74 = vector.load %arg4[%c0_35, %c0_36, %c0_37] : memref<1x2x128xf32, #tpu.memory_space<vmem>>, vector<1x2x128xf32>
    %75 = vector.shape_cast %74 : vector<1x2x128xf32> to vector<2x128xf32>
    %76 = vector.shape_cast %73 : vector<2x128xf32> to vector<1x2x128xf32>
    tpu.vector_store %arg4[%c0_35, %c0_36, %c0_37], %76 {strides = array<i32>} : memref<1x2x128xf32, #tpu.memory_space<vmem>>, vector<1x2x128xf32>,
    return
  }
  func.func @transform_0(%arg0: i32) -> (i32, i32, i32, i32) {
    %c0_i32 = arith.constant 0 : i32
    %c0_i32_0 = arith.constant 0 : i32
    %c0_i32_1 = arith.constant 0 : i32
    %c0_i32_2 = arith.constant 0 : i32
    return %arg0, %c0_i32, %c0_i32_0, %c0_i32_1 : i32, i32, i32, i32
  }
  func.func @transform_1(%arg0: i32) -> (i32, i32, i32) {
    %c0_i32 = arith.constant 0 : i32
    %c0_i32_0 = arith.constant 0 : i32
    %c0_i32_1 = arith.constant 0 : i32
    %c0_i32_2 = arith.constant 0 : i32
    return %c0_i32, %c0_i32_0, %c0_i32_1 : i32, i32, i32
  }
  func.func @transform_2(%arg0: i32) -> (i32, i32) {
    %c0_i32 = arith.constant 0 : i32
    %c0_i32_0 = arith.constant 0 : i32
    return %arg0, %c0_i32 : i32, i32
  }
  func.func @transform_3(%arg0: i32) -> (i32, i32, i32) {
    %c0_i32 = arith.constant 0 : i32
    %c0_i32_0 = arith.constant 0 : i32
    %c0_i32_1 = arith.constant 0 : i32
    return %arg0, %c0_i32, %c0_i32_0 : i32, i32, i32
  }
}

module attributes {stable_mosaic.version = 11 : i64} {
  func.func @bn_apply_kernel(%arg0: i32, %arg1: memref<512x128xf32, #tpu.memory_space<vmem>>, %arg2: memref<1x128xf32, #tpu.memory_space<vmem>>, %arg3: memref<1x128xf32, #tpu.memory_space<vmem>>, %arg4: memref<512x128xf32, #tpu.memory_space<vmem>>) attributes {dimension_semantics = [#tpu.dimension_semantics<parallel>], iteration_bounds = array<i64: 1>, scalar_prefetch = 0 : i64, scratch_operands = 0 : i64, tpu.core_type = #tpu.core_type<tc>, window_params = [{transform_indices = @transform_0, window_bounds = array<i64: 512, 128>}, {pipeline_mode = #tpu.pipeline_mode<synchronous>, transform_indices = @transform_1, window_bounds = array<i64: 1, 128>}, {pipeline_mode = #tpu.pipeline_mode<synchronous>, transform_indices = @transform_2, window_bounds = array<i64: 1, 128>}, {transform_indices = @transform_3, window_bounds = array<i64: 512, 128>}]} {
    %c0 = arith.constant 0 : index
    %c0_0 = arith.constant 0 : index
    %0 = vector.load %arg1[%c0, %c0_0] : memref<512x128xf32, #tpu.memory_space<vmem>>, vector<512x128xf32>
    %c0_1 = arith.constant 0 : index
    %c0_2 = arith.constant 0 : index
    %1 = vector.load %arg2[%c0_1, %c0_2] : memref<1x128xf32, #tpu.memory_space<vmem>>, vector<1x128xf32>
    %2 = vector.broadcast %1 : vector<1x128xf32> to vector<512x128xf32>
    %3 = arith.mulf %0, %2 : vector<512x128xf32>
    %c0_3 = arith.constant 0 : index
    %c0_4 = arith.constant 0 : index
    %4 = vector.load %arg3[%c0_3, %c0_4] : memref<1x128xf32, #tpu.memory_space<vmem>>, vector<1x128xf32>
    %5 = vector.broadcast %4 : vector<1x128xf32> to vector<512x128xf32>
    %6 = arith.addf %3, %5 : vector<512x128xf32>
    %c0_5 = arith.constant 0 : index
    %c0_6 = arith.constant 0 : index
    %7 = vector.load %arg4[%c0_5, %c0_6] : memref<512x128xf32, #tpu.memory_space<vmem>>, vector<512x128xf32>
    tpu.vector_store %arg4[%c0_5, %c0_6], %6 {strides = array<i32>} : memref<512x128xf32, #tpu.memory_space<vmem>>, vector<512x128xf32>,
    return
  }
  func.func @transform_0(%arg0: i32) -> (i32, i32) {
    %c0_i32 = arith.constant 0 : i32
    %c0_i32_0 = arith.constant 0 : i32
    return %arg0, %c0_i32 : i32, i32
  }
  func.func @transform_1(%arg0: i32) -> (i32, i32) {
    %c0_i32 = arith.constant 0 : i32
    %c0_i32_0 = arith.constant 0 : i32
    %c0_i32_1 = arith.constant 0 : i32
    return %c0_i32, %c0_i32_0 : i32, i32
  }
  func.func @transform_2(%arg0: i32) -> (i32, i32) {
    %c0_i32 = arith.constant 0 : i32
    %c0_i32_0 = arith.constant 0 : i32
    %c0_i32_1 = arith.constant 0 : i32
    return %c0_i32, %c0_i32_0 : i32, i32
  }
  func.func @transform_3(%arg0: i32) -> (i32, i32) {
    %c0_i32 = arith.constant 0 : i32
    %c0_i32_0 = arith.constant 0 : i32
    return %arg0, %c0_i32 : i32, i32
  }
}

</mosaic_0001>

<bundles_post_ra>
// kernel: convbn_forward.3
= control target key start
LH: loop header
LB: loop body
LE: loop exit
PB: predicated region body
PF: predicated region fallthrough
CT: control target
= control target key end

     0   :  { %s832_s0 = inlined_call_operand.vmem [shape: f32[512,128], index: 0, kind: input, shape index: {}, may-alias: {0,3}]   ;;  %s833_s1 = inlined_call_operand.vmem [shape: f32[1,128], index: 1, kind: input, shape index: {}]   ;;  %s834_s2 = inlined_call_operand.vmem [shape: f32[1,128], index: 2, kind: input, shape index: {}]   ;;  %s835_s3 = inlined_call_operand.vmem [shape: f32[512,128], index: 3, kind: output, shape index: {}, may-alias: {0,3}]  }
   0x1   :  { %v14_v0 = vld [vmem:[%s832_s0] sm:$0xff]  ;;  %v15_v4 = vld [vmem:[%s832_s0 + $0x8] sm:$0xff]  ;;  %v16_v5 = vld [vmem:[%s832_s0 + $0x10] sm:$0xff] }
   0x2   :  { %v316_v1 = vld [vmem:[%s833_s1] ss:$0 sm:$0xff]  ;;  %v17_v6 = vld [vmem:[%s832_s0 + $0x18] sm:$0xff]  ;;  %v19_v11 = vld [vmem:[%s832_s0 + $0x28] sm:$0xff] }
   0x3   :  { %v321_v2 = vld [vmem:[%s834_s2] ss:$0 sm:$0xff]  ;;  %v85_v3 = vmul.f32 %v316_v1, %v14_v0  ;;  %v86_v7 = vmul.f32 %v316_v1, %v15_v4  ;;  %v87_v8 = vmul.f32 %v316_v1, %v16_v5  ;;  %v88_v9 = vmul.f32 %v316_v1, %v17_v6  ;;  %v20_v12 = vld [vmem:[%s832_s0 + $0x30] sm:$0xff]  ;;  %v21_v17 = vld [vmem:[%s832_s0 + $0x38] sm:$0xff] }
   0x4   :  { %v18_v10 = vld [vmem:[%s832_s0 + $0x20] sm:$0xff]  ;;  %v90_v15 = vmul.f32 %v316_v1, %v19_v11  ;;  %v91_v16 = vmul.f32 %v316_v1, %v20_v12  ;;  %v23_v19 = vld [vmem:[%s832_s0 + $0x48] sm:$0xff]  ;;  %v92_v23 = vmul.f32 %v316_v1, %v21_v17  ;;  %v24_v24 = vld [vmem:[%s832_s0 + $0x50] sm:$0xff] }
   0x5   :  { %v156_v13 = vadd.f32 %v321_v2, %v85_v3  ;;  %v89_v14 = vmul.f32 %v316_v1, %v18_v10  ;;  %v22_v18 = vld [vmem:[%s832_s0 + $0x40] sm:$0xff]  ;;  %v157_v20 = vadd.f32 %v321_v2, %v86_v7  ;;  %v158_v21 = vadd.f32 %v321_v2, %v87_v8  ;;  %v25_v25 = vld [vmem:[%s832_s0 + $0x58] sm:$0xff] }
   0x6   :  { %v159_v22 = vadd.f32 %v321_v2, %v88_v9  ;;  %v26_v26 = vld [vmem:[%s832_s0 + $0x60] sm:$0xff]  ;;  %v161_v28 = vadd.f32 %v321_v2, %v90_v15  ;;  %v162_v29 = vadd.f32 %v321_v2, %v91_v16  ;;  %v93_v30 = vmul.f32 %v316_v1, %v22_v18 }
   0x7   :  { %220 = vst [vmem:[%s835_s3] sm:$0xff] %v156_v13  ;;  %v160_v27 = vadd.f32 %v321_v2, %v89_v14  ;;  %v163_v34 = vadd.f32 %v321_v2, %v92_v23  ;;  %v94_v35 = vmul.f32 %v316_v1, %v23_v19  ;;  %v95_v36 = vmul.f32 %v316_v1, %v24_v24 }
   0x8   :  { %v96_v37 = vmul.f32 %v316_v1, %v25_v25  ;;  %v164_v39 = vadd.f32 %v321_v2, %v93_v30  ;;  %v97_v40 = vmul.f32 %v316_v1, %v26_v26 }
   0x9   :  { %v165_v46 = vadd.f32 %v321_v2, %v94_v35  ;;  %v166_v47 = vadd.f32 %v321_v2, %v95_v36 }
   0xa   :  { %v167_v48 = vadd.f32 %v321_v2, %v96_v37  ;;  %v168_v53 = vadd.f32 %v321_v2, %v97_v40 }
   0xe   :  { %v27_v31 = vld [vmem:[%s832_s0 + $0x68] sm:$0xff]  ;;  %v28_v32 = vld [vmem:[%s832_s0 + $0x70] sm:$0xff]  ;;  %v29_v33 = vld [vmem:[%s832_s0 + $0x78] sm:$0xff] }
   0xf   :  { %221 = vst [vmem:[%s835_s3 + $0x8] sm:$0xff] %v157_v20  ;;  %222 = vst [vmem:[%s835_s3 + $0x10] sm:$0xff] %v158_v21  ;;  %v98_v41 = vmul.f32 %v316_v1, %v27_v31  ;;  %v99_v42 = vmul.f32 %v316_v1, %v28_v32  ;;  %v100_v49 = vmul.f32 %v316_v1, %v29_v33 }
  0x10   :  { %223 = vst [vmem:[%s835_s3 + $0x18] sm:$0xff] %v159_v22 }
  0x11   :  { %v169_v54 = vadd.f32 %v321_v2, %v98_v41  ;;  %v170_v55 = vadd.f32 %v321_v2, %v99_v42  ;;  %v171_v58 = vadd.f32 %v321_v2, %v100_v49 }
  0x17   :  { %v30_v38 = vld [vmem:[%s832_s0 + $0x80] sm:$0xff] }
  0x18   :  { %224 = vst [vmem:[%s835_s3 + $0x20] sm:$0xff] %v160_v27  ;;  %225 = vst [vmem:[%s835_s3 + $0x28] sm:$0xff] %v161_v28  ;;  %v101_v56 = vmul.f32 %v316_v1, %v30_v38 }
  0x19   :  { %226 = vst [vmem:[%s835_s3 + $0x30] sm:$0xff] %v162_v29 }
  0x1a   :  { %v172_v63 = vadd.f32 %v321_v2, %v101_v56 }
  0x20   :  { %v31_v43 = vld [vmem:[%s832_s0 + $0x88] sm:$0xff]  ;;  %v32_v44 = vld [vmem:[%s832_s0 + $0x90] sm:$0xff]  ;;  %v33_v45 = vld [vmem:[%s832_s0 + $0x98] sm:$0xff] }
  0x21   :  { %227 = vst [vmem:[%s835_s3 + $0x38] sm:$0xff] %v163_v34  ;;  %v102_v59 = vmul.f32 %v316_v1, %v31_v43  ;;  %v103_v60 = vmul.f32 %v316_v1, %v32_v44  ;;  %v104_v61 = vmul.f32 %v316_v1, %v33_v45 }
  0x23   :  { %v173_v8 = vadd.f32 %v321_v2, %v102_v59  ;;  %v174_v9 = vadd.f32 %v321_v2, %v103_v60  ;;  %v175_v10 = vadd.f32 %v321_v2, %v104_v61 }
  0x28   :  { %v34_v50 = vld [vmem:[%s832_s0 + $0xa0] sm:$0xff]  ;;  %v35_v51 = vld [vmem:[%s832_s0 + $0xa8] sm:$0xff]  ;;  %v36_v52 = vld [vmem:[%s832_s0 + $0xb0] sm:$0xff] }
  0x29   :  { %228 = vst [vmem:[%s835_s3 + $0x40] sm:$0xff] %v164_v39  ;;  %v105_v0 = vmul.f32 %v316_v1, %v34_v50  ;;  %v106_v3 = vmul.f32 %v316_v1, %v35_v51  ;;  %v107_v4 = vmul.f32 %v316_v1, %v36_v52 }
  0x2b   :  { %v176_v15 = vadd.f32 %v321_v2, %v105_v0  ;;  %v177_v16 = vadd.f32 %v321_v2, %v106_v3  ;;  %v178_v17 = vadd.f32 %v321_v2, %v107_v4 }
  0x30   :  { %v37_v57 = vld [vmem:[%s832_s0 + $0xb8] sm:$0xff] }
  0x31   :  { %229 = vst [vmem:[%s835_s3 + $0x48] sm:$0xff] %v165_v46  ;;  %230 = vst [vmem:[%s835_s3 + $0x50] sm:$0xff] %v166_v47  ;;  %v108_v11 = vmul.f32 %v316_v1, %v37_v57 }
  0x32   :  { %231 = vst [vmem:[%s835_s3 + $0x58] sm:$0xff] %v167_v48 }
  0x33   :  { %v179_v20 = vadd.f32 %v321_v2, %v108_v11 }
  0x39   :  { %v38_v62 = vld [vmem:[%s832_s0 + $0xc0] sm:$0xff] }
  0x3a   :  { %232 = vst [vmem:[%s835_s3 + $0x60] sm:$0xff] %v168_v53  ;;  %233 = vst [vmem:[%s835_s3 + $0x68] sm:$0xff] %v169_v54  ;;  %v109_v18 = vmul.f32 %v316_v1, %v38_v62 }
  0x3b   :  { %234 = vst [vmem:[%s835_s3 + $0x70] sm:$0xff] %v170_v55 }
  0x3c   :  { %v180_v25 = vadd.f32 %v321_v2, %v109_v18 }
  0x42   :  { %v39_v5 = vld [vmem:[%s832_s0 + $0xc8] sm:$0xff]  ;;  %v40_v6 = vld [vmem:[%s832_s0 + $0xd0] sm:$0xff]  ;;  %v41_v7 = vld [vmem:[%s832_s0 + $0xd8] sm:$0xff] }
  0x43   :  { %235 = vst [vmem:[%s835_s3 + $0x78] sm:$0xff] %v171_v58  ;;  %v110_v21 = vmul.f32 %v316_v1, %v39_v5  ;;  %v111_v22 = vmul.f32 %v316_v1, %v40_v6  ;;  %v112_v23 = vmul.f32 %v316_v1, %v41_v7 }
  0x45   :  { %v181_v32 = vadd.f32 %v321_v2, %v110_v21  ;;  %v182_v33 = vadd.f32 %v321_v2, %v111_v22  ;;  %v183_v34 = vadd.f32 %v321_v2, %v112_v23 }
  0x4a   :  { %v42_v12 = vld [vmem:[%s832_s0 + $0xe0] sm:$0xff]  ;;  %v43_v13 = vld [vmem:[%s832_s0 + $0xe8] sm:$0xff]  ;;  %v44_v14 = vld [vmem:[%s832_s0 + $0xf0] sm:$0xff] }
  0x4b   :  { %236 = vst [vmem:[%s835_s3 + $0x80] sm:$0xff] %v172_v63  ;;  %v113_v26 = vmul.f32 %v316_v1, %v42_v12  ;;  %v114_v27 = vmul.f32 %v316_v1, %v43_v13  ;;  %v115_v28 = vmul.f32 %v316_v1, %v44_v14 }
  0x4d   :  { %v184_v39 = vadd.f32 %v321_v2, %v113_v26  ;;  %v185_v40 = vadd.f32 %v321_v2, %v114_v27  ;;  %v186_v41 = vadd.f32 %v321_v2, %v115_v28 }
  0x52   :  { %v45_v19 = vld [vmem:[%s832_s0 + $0xf8] sm:$0xff] }
  0x53   :  { %237 = vst [vmem:[%s835_s3 + $0x88] sm:$0xff] %v173_v8  ;;  %238 = vst [vmem:[%s835_s3 + $0x90] sm:$0xff] %v174_v9  ;;  %v116_v35 = vmul.f32 %v316_v1, %v45_v19 }
  0x54   :  { %239 = vst [vmem:[%s835_s3 + $0x98] sm:$0xff] %v175_v10 }
  0x55   :  { %v187_v44 = vadd.f32 %v321_v2, %v116_v35 }
  0x5b   :  { %v46_v24 = vld [vmem:[%s832_s0 + $0x100] sm:$0xff] }
  0x5c   :  { %240 = vst [vmem:[%s835_s3 + $0xa0] sm:$0xff] %v176_v15  ;;  %241 = vst [vmem:[%s835_s3 + $0xa8] sm:$0xff] %v177_v16  ;;  %v117_v42 = vmul.f32 %v316_v1, %v46_v24 }
  0x5d   :  { %242 = vst [vmem:[%s835_s3 + $0xb0] sm:$0xff] %v178_v17 }
  0x5e   :  { %v188_v49 = vadd.f32 %v321_v2, %v117_v42 }
  0x64   :  { %v47_v29 = vld [vmem:[%s832_s0 + $0x108] sm:$0xff]  ;;  %v48_v30 = vld [vmem:[%s832_s0 + $0x110] sm:$0xff]  ;;  %v49_v31 = vld [vmem:[%s832_s0 + $0x118] sm:$0xff] }
  0x65   :  { %243 = vst [vmem:[%s835_s3 + $0xb8] sm:$0xff] %v179_v20  ;;  %v118_v45 = vmul.f32 %v316_v1, %v47_v29  ;;  %v119_v46 = vmul.f32 %v316_v1, %v48_v30  ;;  %v120_v47 = vmul.f32 %v316_v1, %v49_v31 }
  0x67   :  { %v189_v56 = vadd.f32 %v321_v2, %v118_v45  ;;  %v190_v57 = vadd.f32 %v321_v2, %v119_v46  ;;  %v191_v58 = vadd.f32 %v321_v2, %v120_v47 }
  0x6c   :  { %v50_v36 = vld [vmem:[%s832_s0 + $0x120] sm:$0xff]  ;;  %v51_v37 = vld [vmem:[%s832_s0 + $0x128] sm:$0xff]  ;;  %v52_v38 = vld [vmem:[%s832_s0 + $0x130] sm:$0xff] }
  0x6d   :  { %244 = vst [vmem:[%s835_s3 + $0xc0] sm:$0xff] %v180_v25  ;;  %v121_v50 = vmul.f32 %v316_v1, %v50_v36  ;;  %v122_v51 = vmul.f32 %v316_v1, %v51_v37  ;;  %v123_v52 = vmul.f32 %v316_v1, %v52_v38 }
  0x6f   :  { %v192_v63 = vadd.f32 %v321_v2, %v121_v50  ;;  %v193_v0 = vadd.f32 %v321_v2, %v122_v51  ;;  %v194_v3 = vadd.f32 %v321_v2, %v123_v52 }
  0x74   :  { %v53_v43 = vld [vmem:[%s832_s0 + $0x138] sm:$0xff] }
  0x75   :  { %245 = vst [vmem:[%s835_s3 + $0xc8] sm:$0xff] %v181_v32  ;;  %246 = vst [vmem:[%s835_s3 + $0xd0] sm:$0xff] %v182_v33  ;;  %v124_v59 = vmul.f32 %v316_v1, %v53_v43 }
  0x76   :  { %247 = vst [vmem:[%s835_s3 + $0xd8] sm:$0xff] %v183_v34 }
  0x77   :  { %v195_v6 = vadd.f32 %v321_v2, %v124_v59 }
  0x7d   :  { %v54_v48 = vld [vmem:[%s832_s0 + $0x140] sm:$0xff] }
  0x7e   :  { %248 = vst [vmem:[%s835_s3 + $0xe0] sm:$0xff] %v184_v39  ;;  %249 = vst [vmem:[%s835_s3 + $0xe8] sm:$0xff] %v185_v40  ;;  %v125_v4 = vmul.f32 %v316_v1, %v54_v48 }
  0x7f   :  { %250 = vst [vmem:[%s835_s3 + $0xf0] sm:$0xff] %v186_v41 }
  0x80   :  { %v196_v11 = vadd.f32 %v321_v2, %v125_v4 }
  0x86   :  { %v55_v53 = vld [vmem:[%s832_s0 + $0x148] sm:$0xff]  ;;  %v56_v54 = vld [vmem:[%s832_s0 + $0x150] sm:$0xff]  ;;  %v57_v55 = vld [vmem:[%s832_s0 + $0x158] sm:$0xff] }
  0x87   :  { %251 = vst [vmem:[%s835_s3 + $0xf8] sm:$0xff] %v187_v44  ;;  %v126_v7 = vmul.f32 %v316_v1, %v55_v53  ;;  %v127_v8 = vmul.f32 %v316_v1, %v56_v54  ;;  %v128_v9 = vmul.f32 %v316_v1, %v57_v55 }
  0x89   :  { %v197_v18 = vadd.f32 %v321_v2, %v126_v7  ;;  %v198_v19 = vadd.f32 %v321_v2, %v127_v8  ;;  %v199_v20 = vadd.f32 %v321_v2, %v128_v9 }
  0x8e   :  { %v58_v60 = vld [vmem:[%s832_s0 + $0x160] sm:$0xff]  ;;  %v59_v61 = vld [vmem:[%s832_s0 + $0x168] sm:$0xff]  ;;  %v60_v62 = vld [vmem:[%s832_s0 + $0x170] sm:$0xff] }
  0x8f   :  { %252 = vst [vmem:[%s835_s3 + $0x100] sm:$0xff] %v188_v49  ;;  %v129_v12 = vmul.f32 %v316_v1, %v58_v60  ;;  %v130_v13 = vmul.f32 %v316_v1, %v59_v61  ;;  %v131_v14 = vmul.f32 %v316_v1, %v60_v62 }
  0x91   :  { %v200_v25 = vadd.f32 %v321_v2, %v129_v12  ;;  %v201_v26 = vadd.f32 %v321_v2, %v130_v13  ;;  %v202_v27 = vadd.f32 %v321_v2, %v131_v14 }
  0x96   :  { %v61_v5 = vld [vmem:[%s832_s0 + $0x178] sm:$0xff] }
  0x97   :  { %253 = vst [vmem:[%s835_s3 + $0x108] sm:$0xff] %v189_v56  ;;  %254 = vst [vmem:[%s835_s3 + $0x110] sm:$0xff] %v190_v57  ;;  %v132_v21 = vmul.f32 %v316_v1, %v61_v5 }
  0x98   :  { %255 = vst [vmem:[%s835_s3 + $0x118] sm:$0xff] %v191_v58 }
  0x99   :  { %v203_v30 = vadd.f32 %v321_v2, %v132_v21 }
  0x9f   :  { %v62_v10 = vld [vmem:[%s832_s0 + $0x180] sm:$0xff] }
  0xa0   :  { %256 = vst [vmem:[%s835_s3 + $0x120] sm:$0xff] %v192_v63  ;;  %257 = vst [vmem:[%s835_s3 + $0x128] sm:$0xff] %v193_v0  ;;  %v133_v28 = vmul.f32 %v316_v1, %v62_v10 }
  0xa1   :  { %258 = vst [vmem:[%s835_s3 + $0x130] sm:$0xff] %v194_v3 }
  0xa2   :  { %v204_v35 = vadd.f32 %v321_v2, %v133_v28 }
  0xa8   :  { %v63_v15 = vld [vmem:[%s832_s0 + $0x188] sm:$0xff]  ;;  %v64_v16 = vld [vmem:[%s832_s0 + $0x190] sm:$0xff]  ;;  %v65_v17 = vld [vmem:[%s832_s0 + $0x198] sm:$0xff] }
  0xa9   :  { %259 = vst [vmem:[%s835_s3 + $0x138] sm:$0xff] %v195_v6  ;;  %v134_v31 = vmul.f32 %v316_v1, %v63_v15  ;;  %v135_v32 = vmul.f32 %v316_v1, %v64_v16  ;;  %v136_v33 = vmul.f32 %v316_v1, %v65_v17 }
  0xab   :  { %v205_v42 = vadd.f32 %v321_v2, %v134_v31  ;;  %v206_v43 = vadd.f32 %v321_v2, %v135_v32  ;;  %v207_v44 = vadd.f32 %v321_v2, %v136_v33 }
  0xb0   :  { %v66_v22 = vld [vmem:[%s832_s0 + $0x1a0] sm:$0xff]  ;;  %v67_v23 = vld [vmem:[%s832_s0 + $0x1a8] sm:$0xff]  ;;  %v68_v24 = vld [vmem:[%s832_s0 + $0x1b0] sm:$0xff] }
  0xb1   :  { %260 = vst [vmem:[%s835_s3 + $0x140] sm:$0xff] %v196_v11  ;;  %v137_v36 = vmul.f32 %v316_v1, %v66_v22  ;;  %v138_v37 = vmul.f32 %v316_v1, %v67_v23  ;;  %v139_v38 = vmul.f32 %v316_v1, %v68_v24 }
  0xb3   :  { %v208_v49 = vadd.f32 %v321_v2, %v137_v36  ;;  %v209_v50 = vadd.f32 %v321_v2, %v138_v37  ;;  %v210_v51 = vadd.f32 %v321_v2, %v139_v38 }
  0xb8   :  { %v69_v29 = vld [vmem:[%s832_s0 + $0x1b8] sm:$0xff] }
  0xb9   :  { %261 = vst [vmem:[%s835_s3 + $0x148] sm:$0xff] %v197_v18  ;;  %262 = vst [vmem:[%s835_s3 + $0x150] sm:$0xff] %v198_v19  ;;  %v140_v45 = vmul.f32 %v316_v1, %v69_v29 }
  0xba   :  { %263 = vst [vmem:[%s835_s3 + $0x158] sm:$0xff] %v199_v20 }
  0xbb   :  { %v211_v54 = vadd.f32 %v321_v2, %v140_v45 }
  0xc1   :  { %v70_v34 = vld [vmem:[%s832_s0 + $0x1c0] sm:$0xff] }
  0xc2   :  { %264 = vst [vmem:[%s835_s3 + $0x160] sm:$0xff] %v200_v25  ;;  %265 = vst [vmem:[%s835_s3 + $0x168] sm:$0xff] %v201_v26  ;;  %v141_v52 = vmul.f32 %v316_v1, %v70_v34 }
  0xc3   :  { %266 = vst [vmem:[%s835_s3 + $0x170] sm:$0xff] %v202_v27 }
  0xc4   :  { %v212_v58 = vadd.f32 %v321_v2, %v141_v52 }
  0xca   :  { %v71_v39 = vld [vmem:[%s832_s0 + $0x1c8] sm:$0xff]  ;;  %v72_v40 = vld [vmem:[%s832_s0 + $0x1d0] sm:$0xff]  ;;  %v73_v41 = vld [vmem:[%s832_s0 + $0x1d8] sm:$0xff] }
  0xcb   :  { %267 = vst [vmem:[%s835_s3 + $0x178] sm:$0xff] %v203_v30  ;;  %v142_v55 = vmul.f32 %v316_v1, %v71_v39  ;;  %v143_v56 = vmul.f32 %v316_v1, %v72_v40  ;;  %v144_v57 = vmul.f32 %v316_v1, %v73_v41 }
  0xcd   :  { %v213_v62 = vadd.f32 %v321_v2, %v142_v55  ;;  %v214_v63 = vadd.f32 %v321_v2, %v143_v56  ;;  %v215_v0 = vadd.f32 %v321_v2, %v144_v57 }
  0xd2   :  { %v74_v46 = vld [vmem:[%s832_s0 + $0x1e0] sm:$0xff]  ;;  %v75_v47 = vld [vmem:[%s832_s0 + $0x1e8] sm:$0xff]  ;;  %v76_v48 = vld [vmem:[%s832_s0 + $0x1f0] sm:$0xff] }
  0xd3   :  { %268 = vst [vmem:[%s835_s3 + $0x180] sm:$0xff] %v204_v35  ;;  %v145_v59 = vmul.f32 %v316_v1, %v74_v46  ;;  %v146_v60 = vmul.f32 %v316_v1, %v75_v47  ;;  %v147_v61 = vmul.f32 %v316_v1, %v76_v48 }
  0xd5   :  { %v216_v4 = vadd.f32 %v321_v2, %v145_v59  ;;  %v217_v5 = vadd.f32 %v321_v2, %v146_v60  ;;  %v218_v6 = vadd.f32 %v321_v2, %v147_v61 }
  0xda   :  { %v77_v53 = vld [vmem:[%s832_s0 + $0x1f8] sm:$0xff] }
  0xdb   :  { %269 = vst [vmem:[%s835_s3 + $0x188] sm:$0xff] %v205_v42  ;;  %270 = vst [vmem:[%s835_s3 + $0x190] sm:$0xff] %v206_v43  ;;  %v148_v3 = vmul.f32 %v316_v1, %v77_v53 }
  0xdc   :  { %271 = vst [vmem:[%s835_s3 + $0x198] sm:$0xff] %v207_v44  ;;  %272 = vst [vmem:[%s835_s3 + $0x1a0] sm:$0xff] %v208_v49 }
  0xdd   :  { %273 = vst [vmem:[%s835_s3 + $0x1a8] sm:$0xff] %v209_v50  ;;  %274 = vst [vmem:[%s835_s3 + $0x1b0] sm:$0xff] %v210_v51  ;;  %v219_v1 = vadd.f32 %v321_v2, %v148_v3 }
  0xde   :  { %275 = vst [vmem:[%s835_s3 + $0x1b8] sm:$0xff] %v211_v54  ;;  %276 = vst [vmem:[%s835_s3 + $0x1c0] sm:$0xff] %v212_v58 }
  0xdf   :  { %277 = vst [vmem:[%s835_s3 + $0x1c8] sm:$0xff] %v213_v62  ;;  %278 = vst [vmem:[%s835_s3 + $0x1d0] sm:$0xff] %v214_v63 }
  0xe0   :  { %279 = vst [vmem:[%s835_s3 + $0x1d8] sm:$0xff] %v215_v0  ;;  %280 = vst [vmem:[%s835_s3 + $0x1e0] sm:$0xff] %v216_v4 }
  0xe1   :  { %281 = vst [vmem:[%s835_s3 + $0x1e8] sm:$0xff] %v217_v5  ;;  %282 = vst [vmem:[%s835_s3 + $0x1f0] sm:$0xff] %v218_v6 }
  0xe2   :  { %283 = vst [vmem:[%s835_s3 + $0x1f8] sm:$0xff] %v219_v1 }

// kernel: convbn_forward.2
= control target key start
LH: loop header
LB: loop body
LE: loop exit
PB: predicated region body
PF: predicated region fallthrough
CT: control target
= control target key end

     0   :  { %s3744_s12 = smov 0   ;;  %s4672_s0 = inlined_call_operand.vmem [shape: bf16[2,18,18,4], index: 0, kind: input, shape index: {}]   ;;  %s4673_s1 = inlined_call_operand.vmem [shape: bf16[9,4,128], index: 1, kind: input, shape index: {}]   ;;  %s4674_s2 = inlined_call_operand.vmem [shape: f32[512,128], index: 2, kind: output, shape index: {0}]   ;;  %s4675_s3 = inlined_call_operand.vmem [shape: f32[2,2,128], index: 3, kind: output, shape index: {1}]  }
   0x1 LB: > { %s3750_s13 = sadd.s32 4294967295, %s3722_s12   ;;  %p2767_p0 = scmp.ge.s32.totalorder %s3722_s12, 1  ;;  %s3722_s12 = sphi %s3744_s12, %s14_s12  }
   0x2   : > { %p140_p1 = scmp.lt.s32.totalorder %s3722_s12, 3 }
   0x4   : > { %p141_p2 = pnand %p2767_p0, %p140_p1 }
   0x6   : > { %144 = sbr.rel (%p141_p2) target bundleno = 551 (0x227), region = 28 }
   0xd   : > { %v2788_v0 = vld [vmem:[%s4673_s1 + $0x2] sm:$0x3]  ;;  %vm537_vm0 = vcmask 1041408   ;;  %v3760_v1 = vld [vmem:[%s4673_s1 + $0x8] sm:$0x3]  ;;  %p168_p3 = scmp.lt.s32.totalorder %s3750_s13, 1 }
   0xe   : > { %3661 = vmatprep.subr.msk.bf16.mxu1 %vm537_vm0, %v2788_v0  ;;  %3665 = vmatprep.subr.msk.bf16.mxu0 %vm537_vm0, %v3760_v1  ;;  %v539_v2 = vsel %vm537_vm0, %v2788_v0, 0  ;;  %v3769_v3 = vsel %vm537_vm0, %v3760_v1, 0  ;;  %v308_v4 = vld [vmem:[%s4673_s1] sm:$0x3]  ;;  %v2873_v5 = vld [vmem:[%s4673_s1 + $0xa] sm:$0x3] }
   0xf   : > { %4714 = vst [vmem:[#allocation2_spill] sm:$0xff] %v3769_v3  ;;  %3098 = vmatpush3.bf16.msra.mxu1 %v539_v2  ;;  %3234 = vmatpush3.bf16.msra.mxu0 %v3769_v3  ;;  %s3776_s20 = scalar_select %p168_p3, %s3750_s13, 1  ;;  %vm357_vm1 = vcmask 1046528   ;;  %vm488_vm2 = vcmask 31744   ;;  %v751_v37 = vsel %vm537_vm0, %v308_v4, 0  ;;  %v1717_v43 = vsel %vm537_vm0, %v2873_v5, 0 }
  0x10   : > { %3662 = vmatprep.subr.msk.bf16.mxu1 %vm537_vm0, %v308_v4  ;;  %3667 = vmatprep.subr.msk.bf16.mxu0 %vm537_vm0, %v2873_v5  ;;  %v3858_v44 = vld [vmem:[%s4673_s1 + $0x4] sm:$0x3]  ;;  %v3902_v2 = vld [vmem:[%s4673_s1 + $0xc] sm:$0x3]  ;;  %vm914_vm3 = vcmask 1045504   ;;  %s2769_s10 = sshll.u32 %s3750_s13, 5 }
  0x11   : > { %s3671_s23 = smul.u32 216, %s3776_s20  ;;  %p174_p4 = scmp.lt.s32.totalorder %s2769_s10, 63  ;;  %vm2673_vm4 = vcmask 1040384  }
  0x12   : > { %s2771_s13 = sshll.u32 %s3776_s20, 1 }
  0x13   : > { %s3787_s26 = scalar_lea.vmem %s4672_s0, %s3671_s23  ;;  %s4756_s10 = smov (!%p174_p4, %s2769_s10), 63 }
  0x14   : > { %v3790_v6 = vld [vmem:[%s3787_s26] sm:$0xff]   ;;  %v3793_v7 = vld [vmem:[%s3787_s26 + $0x8] sm:$0x1]  ;;  %v3796_v8 = vld [vmem:[%s3787_s26 + $0xc] sm:$0xff]   ;;  %s2770_s11 = sshll.u32 %s4756_s10, 3  ;;  %s182_s19 = scalar_lea.vmem %s4675_s3, %s2771_s13 }
  0x15   : > { %v4678_v9 = vunpack.c.l.bf16 %v3790_v6  ;;  %v4677_v10 = vunpack.c.h.bf16 %v3790_v6  ;;  %v4676_v11 = vunpack.c.l.bf16 %v3793_v7  ;;  %v3802_v12 = vld [vmem:[%s3787_s26 + $0x14] sm:$0x1]  ;;  %v241_v13 = vunpack.c.l.bf16 %v3796_v8  ;;  %v3806_v14 = vld [vmem:[%s3787_s26 + $0x18] sm:$0xff]   ;;  %v3822_v23 = vld [vmem:[%s3787_s26 + $0x20] sm:$0x1]  ;;  %s4626_s16 = scalar_lea.vmem %s4674_s2, %s2770_s11 }
  0x16   : > { %v242_v15 = vunpack.c.h.bf16 %v3796_v8  ;;  %v243_v16 = vunpack.c.l.bf16 %v3802_v12  ;;  %v244_v20 = vunpack.c.l.bf16 %v3806_v14  ;;  %v3829_v27 = vld [vmem:[%s3787_s26 + $0x24] sm:$0xff]   ;;  %v245_v31 = vunpack.c.h.bf16 %v3806_v14  ;;  %v3838_v34 = vld [vmem:[%s3787_s26 + $0x2c] sm:$0x1]  ;;  %v3841_v35 = vld [vmem:[%s3787_s26 + $0x30] sm:$0xff]  }
  0x17   : > { %v358_v17 = vrot.slane %v4678_v9, 1  ;;  %v359_v18 = vrot.slane %v4677_v10, 1  ;;  %v361_v19 = vrot.slane %v4676_v11, 1  ;;  %v363_v21 = vrot.slane %v241_v13, 1  ;;  %v3848_v40 = vld [vmem:[%s3787_s26 + $0x38] sm:$0x1] }
  0x18   : > { %v364_v22 = vrot.slane %v242_v15, 1  ;;  %v366_v26 = vrot.slane %v243_v16, 1  ;;  %v246_v32 = vunpack.c.l.bf16 %v3822_v23  ;;  %v368_v33 = vrot.slane %v244_v20, 1  ;;  %v3869_v49 = vld [vmem:[%s3787_s26 + $0x3c] sm:$0xff]   ;;  %v3876_v54 = vld [vmem:[%s3787_s26 + $0x44] sm:$0x1] }
  0x19   : > { %v360_v24 = vsel %vm357_vm1, %v358_v17, %v359_v18  ;;  %v362_v25 = vsel %vm357_vm1, %v359_v18, %v361_v19  ;;  %v247_v38 = vunpack.c.l.bf16 %v3829_v27  ;;  %v248_v39 = vunpack.c.h.bf16 %v3829_v27  ;;  %v3879_v55 = vld [vmem:[%s3787_s26 + $0x48] sm:$0xff]   ;;  %v3897_v0 = vld [vmem:[%s3787_s26 + $0x50] sm:$0x1]  ;;  %v3913_v19 = vld [vmem:[%s3787_s26 + $0x54] sm:$0xff]  }
  0x1a   : > { %v470_v28 = vpack.c.bf16 %v362_v25, %v360_v24  ;;  %v365_v29 = vsel %vm357_vm1, %v363_v21, %v364_v22  ;;  %v367_v30 = vsel %vm357_vm1, %v364_v22, %v366_v26  ;;  %v369_v41 = vrot.slane %v245_v31, 1  ;;  %v3922_v26 = vld [vmem:[%s3787_s26 + $0x5c] sm:$0x1] }
  0x1b   : > { %v471_v36 = vpack.c.bf16 %v367_v30, %v365_v29  ;;  %v371_v42 = vrot.slane %v246_v32, 1  ;;  %v249_v45 = vunpack.c.l.bf16 %v3838_v34  ;;  %v373_v46 = vrot.slane %v247_v38, 1 }
  0x1c   : > { %3099 = vmatprep.mubr.msk.bf16.mxu1 %vm488_vm2, %v470_v28  ;;  %v374_v47 = vrot.slane %v248_v39, 1  ;;  %v250_v48 = vunpack.c.l.bf16 %v3841_v35  ;;  %v370_v50 = vsel %vm357_vm1, %v368_v33, %v369_v41  ;;  %v251_v52 = vunpack.c.h.bf16 %v3841_v35 }
  0x1d   : > { %3235 = vmatprep.mubr.msk.bf16.mxu0 %vm488_vm2, %v471_v36  ;;  %3100 = vmatmul.mubr.msk.bf16.vlgmr.msra.gmra.mrb[0].mxu1 %vm488_vm2, %v471_v36  ;;  %v372_v51 = vsel %vm357_vm1, %v369_v41, %v371_v42  ;;  %v252_v53 = vunpack.c.l.bf16 %v3848_v40  ;;  %v376_v58 = vrot.slane %v249_v45, 1  ;;  %v253_v62 = vunpack.c.l.bf16 %v3869_v49 }
  0x1e   : > { %3132 = vmatpush3.bf16.msra.mxu1 %v751_v37  ;;  %v3881_v56 = vpack.c.bf16 %v372_v51, %v370_v50  ;;  %v375_v57 = vsel %vm357_vm1, %v373_v46, %v374_v47  ;;  %v378_v59 = vrot.slane %v250_v48, 1  ;;  %v379_v60 = vrot.slane %v251_v52, 1  ;;  %v3949_v51 = vld [vmem:[%s3787_s26 + $0x60] sm:$0xff]  }
  0x1f   : > { %3663 = vmatprep.subr.msk.bf16.mxu1 %vm537_vm0, %v3858_v44  ;;  %v381_v61 = vrot.slane %v252_v53, 1  ;;  %v254_v63 = vunpack.c.h.bf16 %v3869_v49  ;;  %v377_v4 = vsel %vm357_vm1, %v374_v47, %v376_v58  ;;  %v4694_v5 = vunpack.c.l.bf16 %v3876_v54  ;;  %v3956_v58 = vld [vmem:[%s3787_s26 + $0x68] sm:$0x1] }
  0x20   : > { %3236 = vmatmul.mubr.msk.bf16.vlgmr.msra.gmra.mrb[0].mxu0 %vm488_vm2, %v3881_v56  ;;  %3103 = vmatprep.mubr.msk.bf16.mxu1 %vm488_vm2, %v3881_v56  ;;  %v4693_v17 = vunpack.c.l.bf16 %v3879_v55  ;;  %v4688_v18 = vunpack.c.h.bf16 %v3879_v55  ;;  %v3915_v21 = vpack.c.bf16 %v377_v4, %v375_v57  ;;  %v380_v22 = vsel %vm357_vm1, %v378_v59, %v379_v60 }
  0x21   : > { %3268 = vmatpush3.bf16.msra.mxu0 %v1717_v43  ;;  %v382_v24 = vsel %vm357_vm1, %v379_v60, %v381_v61  ;;  %v383_v25 = vrot.slane %v253_v62, 1  ;;  %v384_v29 = vrot.slane %v254_v63, 1  ;;  %v386_v30 = vrot.slane %v4694_v5, 1 }
  0x22   : > { %v3924_v28 = vpack.c.bf16 %v382_v24, %v380_v22  ;;  %v4685_v33 = vunpack.c.l.bf16 %v3897_v0  ;;  %3668 = vmatprep.subr.msk.bf16.mxu0 %vm537_vm0, %v3902_v2  ;;  %3239 = vmatprep.mubr.msk.bf16.mxu0 %vm488_vm2, %v3915_v21  ;;  %v388_v36 = vrot.slane %v4693_v17, 1  ;;  %v389_v37 = vrot.slane %v4688_v18, 1 }
  0x23   : > { %v4684_v41 = vunpack.c.l.bf16 %v3913_v19  ;;  %v4683_v42 = vunpack.c.h.bf16 %v3913_v19  ;;  %v385_v43 = vsel %vm357_vm1, %v383_v25, %v384_v29  ;;  %v387_v46 = vsel %vm357_vm1, %v384_v29, %v386_v30  ;;  %v3974_v30 = vld [vmem:[%s3787_s26 + $0x6c] sm:$0xff]  }
  0x24   : > { %v391_v47 = vrot.slane %v4685_v33, 1  ;;  %v4679_v50 = vunpack.c.l.bf16 %v3922_v26  ;;  %v3953_v57 = vpack.c.bf16 %v387_v46, %v385_v43  ;;  %v4682_v4 = vunpack.c.l.bf16 %v3949_v51 }
  0x25   : > { %3104 = vmatmul.mubr.msk.bf16.gmra.mrb[4].mxu1 %vm488_vm2, %v3915_v21  ;;  %v393_v59 = vrot.slane %v4684_v41, 1  ;;  %v394_v60 = vrot.slane %v4683_v42, 1  ;;  %v390_v22 = vsel %vm357_vm1, %v388_v36, %v389_v37  ;;  %v4681_v25 = vunpack.c.h.bf16 %v3949_v51  ;;  %v3981_v36 = vld [vmem:[%s3787_s26 + $0x74] sm:$0x1] }
  0x26   : > { %3107 = vmatprep.mubr.msk.bf16.mxu1 %vm488_vm2, %v3924_v28  ;;  %v396_v61 = vrot.slane %v4679_v50, 1  ;;  %v392_v24 = vsel %vm357_vm1, %v389_v37, %v391_v47  ;;  %v4680_v29 = vunpack.c.l.bf16 %v3956_v58  ;;  %v920_v43 = vrot.slane %v241_v13, 2  ;;  %v3992_v50 = vld [vmem:[%s3787_s26 + $0x78] sm:$0xff]   ;;  %v3995_v13 = vld [vmem:[%s3787_s26 + $0x80] sm:$0x1] }
  0x27   : > { %v395_v46 = vsel %vm357_vm1, %v393_v59, %v394_v60  ;;  %v921_v37 = vrot.slane %v242_v15, 2  ;;  %v923_v47 = vrot.slane %v243_v16, 2  ;;  %v3987_v10 = vpack.c.bf16 %v392_v24, %v390_v22 }
  0x28   : > { %3240 = vmatmul.mubr.msk.bf16.gmra.mrb[4].mxu0 %vm488_vm2, %v3924_v28  ;;  %v397_v11 = vsel %vm357_vm1, %v394_v60, %v396_v61  ;;  %v398_v9 = vrot.slane %v4682_v4, 1  ;;  %v399_v59 = vrot.slane %v4681_v25, 1  ;;  %v401_v15 = vrot.slane %v4680_v29, 1 }
  0x29   : > { %3243 = vmatprep.mubr.msk.bf16.mxu0 %vm488_vm2, %v3953_v57  ;;  %v4687_v12 = vunpack.c.l.bf16 %v3974_v30  ;;  %v4686_v16 = vunpack.c.h.bf16 %v3974_v30  ;;  %v4007_v60 = vpack.c.bf16 %v397_v11, %v395_v46  ;;  %v4692_v61 = vunpack.c.l.bf16 %v3981_v36 }
  0x2a   : > { %v925_v22 = vrot.slane %v244_v20, 2  ;;  %v4690_v24 = vunpack.c.l.bf16 %v3992_v50  ;;  %v4689_v29 = vunpack.c.h.bf16 %v3992_v50  ;;  %v4691_v25 = vunpack.c.l.bf16 %v3995_v13 }
  0x2b   : > { %v926_v4 = vrot.slane %v245_v31, 2  ;;  %v928_v42 = vrot.slane %v246_v32, 2  ;;  %v922_v11 = vsel %vm914_vm3, %v920_v43, %v921_v37  ;;  %v924_v46 = vsel %vm914_vm3, %v921_v37, %v923_v47  ;;  %v4030_v31 = vld [vmem:[%s3787_s26 + $0x84] sm:$0xff]   ;;  %v4033_v32 = vld [vmem:[%s3787_s26 + $0x8c] sm:$0x1] }
  0x2c   : > { %v400_v20 = vsel %vm357_vm1, %v398_v9, %v399_v59  ;;  %v402_v41 = vsel %vm357_vm1, %v399_v59, %v401_v15  ;;  %v403_v33 = vrot.slane %v4687_v12, 1  ;;  %v404_v23 = vrot.slane %v4686_v16, 1  ;;  %v4048_v15 = vld [vmem:[%s3787_s26 + $0x90] sm:$0xff]  }
  0x2d   : > { %3108 = vmatmul.mubr.msk.bf16.gmra.mrb[8].mxu1 %vm488_vm2, %v3953_v57  ;;  %v406_v43 = vrot.slane %v4692_v61, 1  ;;  %v4039_v9 = vpack.c.bf16 %v924_v46, %v922_v11  ;;  %v408_v37 = vrot.slane %v4690_v24, 1  ;;  %v409_v47 = vrot.slane %v4689_v29, 1  ;;  %v4056_v46 = vld [vmem:[%s3787_s26 + $0x98] sm:$0x1] }
  0x2e   : > { %3111 = vmatprep.mubr.msk.bf16.mxu1 %vm488_vm2, %v3987_v10  ;;  %v411_v59 = vrot.slane %v4691_v25, 1  ;;  %v4050_v16 = vpack.c.bf16 %v402_v41, %v400_v20  ;;  %v4700_v12 = vunpack.c.l.bf16 %v4030_v31  ;;  %v4699_v18 = vunpack.c.h.bf16 %v4030_v31 }
  0x2f   : > { %v4695_v11 = vunpack.c.l.bf16 %v4033_v32  ;;  %v405_v29 = vsel %vm357_vm1, %v403_v33, %v404_v23  ;;  %v927_v24 = vsel %vm914_vm3, %v925_v22, %v926_v4  ;;  %v929_v25 = vsel %vm914_vm3, %v926_v4, %v928_v42 }
  0x30   : > { %3244 = vmatmul.mubr.msk.bf16.gmra.mrb[8].mxu0 %vm488_vm2, %v3987_v10  ;;  %v930_v41 = vrot.slane %v247_v38, 2  ;;  %v407_v20 = vsel %vm357_vm1, %v404_v23, %v406_v43  ;;  %v931_v61 = vrot.slane %v248_v39, 2  ;;  %v4698_v17 = vunpack.c.l.bf16 %v4048_v15 }
  0x31   : > { %3247 = vmatprep.mubr.msk.bf16.mxu0 %vm488_vm2, %v4007_v60  ;;  %v4696_v5 = vunpack.c.h.bf16 %v4048_v15  ;;  %v410_v33 = vsel %vm357_vm1, %v408_v37, %v409_v47  ;;  %v412_v42 = vsel %vm357_vm1, %v409_v47, %v411_v59  ;;  %v933_v38 = vrot.slane %v249_v45, 2 }
  0x32   : > { %v4697_v4 = vunpack.c.l.bf16 %v4056_v46  ;;  %v413_v22 = vrot.slane %v4700_v12, 1  ;;  %v414_v39 = vrot.slane %v4699_v18, 1  ;;  %v416_v23 = vrot.slane %v4695_v11, 1  ;;  %v4099_v11 = vld [vmem:[%s3787_s26 + $0x9c] sm:$0xff]  }
  0x33   : > { %v4085_v43 = vpack.c.bf16 %v407_v20, %v405_v29  ;;  %v4087_v37 = vpack.c.bf16 %v929_v25, %v927_v24  ;;  %v4091_v34 = vpack.c.bf16 %v412_v42, %v410_v33  ;;  %v932_v45 = vsel %vm914_vm3, %v930_v41, %v931_v61  ;;  %v4109_v41 = vld [vmem:[%s3787_s26 + $0xa4] sm:$0x1] }
  0x34   : > { %v418_v47 = vrot.slane %v4698_v17, 1  ;;  %v419_v59 = vrot.slane %v4696_v5, 1  ;;  %v934_v25 = vsel %vm914_vm3, %v931_v61, %v933_v38  ;;  %v935_v29 = vrot.slane %v250_v48, 2  ;;  %v4118_v38 = vld [vmem:[%s3787_s26 + $0xa8] sm:$0xff]   ;;  %v4121_v48 = vld [vmem:[%s3787_s26 + $0xb0] sm:$0x1] }
  0x35   : > { %3112 = vmatmul.mubr.msk.bf16.gmra.mrb[12].mxu1 %vm488_vm2, %v4007_v60  ;;  %v936_v24 = vrot.slane %v251_v52, 2  ;;  %v421_v20 = vrot.slane %v4697_v4, 1  ;;  %v415_v33 = vsel %vm357_vm1, %v413_v22, %v414_v39  ;;  %v417_v42 = vsel %vm357_vm1, %v414_v39, %v416_v23 }
  0x36   : > { %3115 = vmatprep.mubr.msk.bf16.mxu1 %vm488_vm2, %v4050_v16  ;;  %v938_v5 = vrot.slane %v252_v53, 2  ;;  %v940_v61 = vrot.slane %v253_v62, 2  ;;  %v941_v52 = vrot.slane %v254_v63, 2  ;;  %v4715_v22 = vunpack.c.l.bf16 %v3876_v54 }
  0x37   : > { %v4706_v39 = vunpack.c.l.bf16 %v4099_v11  ;;  %v4705_v40 = vunpack.c.h.bf16 %v4099_v11  ;;  %v1919_v53 = vsel %vm537_vm0, %v3902_v2, 0  ;;  %v4135_v62 = vpack.c.bf16 %v934_v25, %v932_v45 }
  0x38   : > { %3248 = vmatmul.mubr.msk.bf16.gmra.mrb[12].mxu0 %vm488_vm2, %v4050_v16  ;;  %v943_v4 = vrot.slane %v4715_v22, 2  ;;  %v420_v23 = vsel %vm357_vm1, %v418_v47, %v419_v59  ;;  %v4703_v17 = vunpack.c.l.bf16 %v4109_v41  ;;  %v422_v63 = vsel %vm357_vm1, %v419_v59, %v421_v20  ;;  %v4150_v47 = vld [vmem:[%s4673_s1 + $0xe] sm:$0x3] }
  0x39   : > { %3269 = vmatprep.mubr.msk.bf16.mxu0 %vm488_vm2, %v4039_v9  ;;  %v4701_v54 = vunpack.c.l.bf16 %v4118_v38  ;;  %v4702_v22 = vunpack.c.h.bf16 %v4118_v38  ;;  %v4704_v18 = vunpack.c.l.bf16 %v4121_v48  ;;  %v4143_v12 = vpack.c.bf16 %v417_v42, %v415_v33 }
  0x3a   : > { %v937_v2 = vsel %vm914_vm3, %v935_v29, %v936_v24  ;;  %v939_v45 = vsel %vm914_vm3, %v936_v24, %v938_v5  ;;  %v942_v59 = vsel %vm914_vm3, %v940_v61, %v941_v52  ;;  %v944_v25 = vsel %vm914_vm3, %v941_v52, %v943_v4  ;;  %v4175_v52 = vld [vmem:[%s3787_s26 + $0xb4] sm:$0xff]  }
  0x3b   : > { %4716 = vst [vmem:[#allocation3_spill] sm:$0xff] %v4143_v12  ;;  %v423_v20 = vrot.slane %v4706_v39, 1  ;;  %v424_v29 = vrot.slane %v4705_v40, 1  ;;  %v4162_v5 = vpack.c.bf16 %v422_v63, %v420_v23  ;;  %v426_v24 = vrot.slane %v4703_v17, 1 }
  0x3c   : > { %v4166_v33 = vpack.c.bf16 %v939_v45, %v937_v2  ;;  %v428_v4 = vrot.slane %v4701_v54, 1  ;;  %v429_v42 = vrot.slane %v4702_v22, 1  ;;  %v431_v61 = vrot.slane %v4704_v18, 1 }
  0x3d   : > { %3116 = vmatmul.mubr.msk.bf16.gmra.mrb[16].mxu1 %vm488_vm2, %v4085_v43  ;;  %v4182_v23 = vpack.c.bf16 %v944_v25, %v942_v59  ;;  %v4717_v63 = vunpack.c.l.bf16 %v3879_v55  ;;  %v4718_v45 = vunpack.c.h.bf16 %v3879_v55  ;;  %v4719_v22 = vunpack.c.l.bf16 %v3897_v0 }
  0x3e   : > { %3119 = vmatprep.mubr.msk.bf16.mxu1 %vm488_vm2, %v4091_v34  ;;  %v425_v18 = vsel %vm357_vm1, %v423_v20, %v424_v29  ;;  %v4720_v40 = vunpack.c.l.bf16 %v3913_v19  ;;  %v4721_v59 = vunpack.c.h.bf16 %v3913_v19  ;;  %v4722_v3 = vunpack.c.l.bf16 %v3922_v26 }
  0x3f   : > { %v945_v2 = vrot.slane %v4717_v63, 2  ;;  %v946_v54 = vrot.slane %v4718_v45, 2  ;;  %v948_v17 = vrot.slane %v4719_v22, 2  ;;  %v427_v0 = vsel %vm357_vm1, %v424_v29, %v426_v24 }
  0x40   : > { %3270 = vmatmul.mubr.msk.bf16.vlgmr.msra.gmra.mrb[0].mxu0 %vm488_vm2, %v4087_v37  ;;  %v950_v39 = vrot.slane %v4720_v40, 2  ;;  %v951_v25 = vrot.slane %v4721_v59, 2  ;;  %v953_v63 = vrot.slane %v4722_v3, 2  ;;  %v4711_v22 = vunpack.c.l.bf16 %v4175_v52 }
  0x41   : > { %3302 = vmatpush3.bf16.msra.mxu0 %v1919_v53  ;;  %3273 = vmatprep.mubr.msk.bf16.mxu0 %vm488_vm2, %v4135_v62  ;;  %v4178_v53 = vld [vmem:[%s3787_s26 + $0xbc] sm:$0x1]  ;;  %v4710_v45 = vunpack.c.h.bf16 %v4175_v52  ;;  %v432_v40 = vsel %vm357_vm1, %v429_v42, %v431_v61  ;;  %v947_v59 = vsel %vm914_vm3, %v945_v2, %v946_v54  ;;  %v4210_v3 = vpack.c.bf16 %v427_v0, %v425_v18 }
  0x42   : > { %3669 = vmatprep.subr.msk.bf16.mxu0 %vm537_vm0, %v4150_v47  ;;  %v949_v26 = vsel %vm914_vm3, %v946_v54, %v948_v17  ;;  %v952_v29 = vsel %vm914_vm3, %v950_v39, %v951_v25  ;;  %v954_v24 = vsel %vm914_vm3, %v951_v25, %v953_v63  ;;  %v4724_v18 = vunpack.c.l.bf16 %v4178_v53 }
  0x43   : > { %v4227_v17 = vpack.c.bf16 %v949_v26, %v947_v59  ;;  %v4229_v39 = vpack.c.bf16 %v954_v24, %v952_v29  ;;  %v4725_v54 = vunpack.c.l.bf16 %v3949_v51  ;;  %v4726_v63 = vunpack.c.h.bf16 %v3949_v51 }
  0x44   : > { %v436_v61 = vrot.slane %v4724_v18, 1  ;;  %v4728_v59 = vunpack.c.l.bf16 %v3974_v30  ;;  %v4729_v29 = vunpack.c.h.bf16 %v3974_v30 }
  0x45   : > { %3120 = vmatmul.mubr.msk.bf16.gmra.mrb[20].mxu1 %vm488_vm2, %v4143_v12  ;;  %v430_v12 = vsel %vm357_vm1, %v428_v4, %v429_v42  ;;  %v433_v4 = vrot.slane %v4711_v22, 1  ;;  %v434_v42 = vrot.slane %v4710_v45, 1  ;;  %v956_v0 = vrot.slane %v4726_v63, 2 }
  0x46   : > { %3123 = vmatprep.mubr.msk.bf16.mxu1 %vm488_vm2, %v4162_v5  ;;  %v4217_v20 = vpack.c.bf16 %v432_v40, %v430_v12  ;;  %v955_v12 = vrot.slane %v4725_v54, 2  ;;  %v4727_v40 = vunpack.c.l.bf16 %v3956_v58  ;;  %v960_v26 = vrot.slane %v4728_v59, 2 }
  0x47   : > { %v435_v2 = vsel %vm357_vm1, %v433_v4, %v434_v42  ;;  %v437_v25 = vsel %vm357_vm1, %v434_v42, %v436_v61  ;;  %v961_v24 = vrot.slane %v4729_v29, 2  ;;  %v4730_v54 = vunpack.c.l.bf16 %v3981_v36 }
  0x48   : > { %3274 = vmatmul.mubr.msk.bf16.gmra.mrb[4].mxu0 %vm488_vm2, %v4166_v33  ;;  %4723 = vst [vmem:[#allocation4_spill] sm:$0xff] %v4217_v20  ;;  %v958_v18 = vrot.slane %v4727_v40, 2  ;;  %v4731_v22 = vunpack.c.l.bf16 %v3790_v6  ;;  %v4732_v42 = vunpack.c.h.bf16 %v3790_v6  ;;  %v4733_v63 = vunpack.c.l.bf16 %v3793_v7 }
  0x49   : > { %3277 = vmatprep.mubr.msk.bf16.mxu0 %vm488_vm2, %v4182_v23  ;;  %v963_v45 = vrot.slane %v4730_v54, 2  ;;  %v4255_v58 = vpack.c.bf16 %v437_v25, %v435_v2  ;;  %v957_v36 = vsel %vm914_vm3, %v955_v12, %v956_v0  ;;  %v4734_v2 = vunpack.c.l.bf16 %v3992_v50 }
  0x4a   : > { %v915_v4 = vrot.slane %v4731_v22, 2  ;;  %v916_v61 = vrot.slane %v4732_v42, 2  ;;  %v959_v40 = vsel %vm914_vm3, %v956_v0, %v958_v18  ;;  %v962_v22 = vsel %vm914_vm3, %v960_v26, %v961_v24 }
  0x4b   : > { %v964_v59 = vsel %vm914_vm3, %v961_v24, %v963_v45  ;;  %v4268_v7 = vpack.c.bf16 %v959_v40, %v957_v36  ;;  %v965_v25 = vrot.slane %v4734_v2, 2  ;;  %v4735_v45 = vunpack.c.h.bf16 %v3992_v50 }
  0x4c   : > { %v4264_v29 = vsel %vm914_vm3, %v915_v4, %v916_v61  ;;  %v4277_v12 = vpack.c.bf16 %v964_v59, %v962_v22  ;;  %v4736_v18 = vunpack.c.l.bf16 %v3995_v13  ;;  %v4737_v4 = vunpack.c.l.bf16 %v4030_v31 }
  0x4d   : > { %3124 = vmatmul.mubr.msk.bf16.gmra.mrb[24].mxu1 %vm488_vm2, %v4210_v3  ;;  %v966_v0 = vrot.slane %v4735_v45, 2  ;;  %v1094_v40 = vsel %vm537_vm0, %v3858_v44, 0  ;;  %v4740_v44 = vunpack.c.l.bf16 %v4048_v15 }
  0x4e   : > { %3127 = vmatprep.mubr.msk.bf16.mxu1 %vm488_vm2, %v4217_v20  ;;  %v918_v20 = vrot.slane %v4733_v63, 2  ;;  %v968_v26 = vrot.slane %v4736_v18, 2  ;;  %v970_v42 = vrot.slane %v4737_v4, 2  ;;  %v4739_v63 = vunpack.c.l.bf16 %v4033_v32  ;;  %v4304_v32 = vld [vmem:[%s4673_s1 + $0x6] sm:$0x3] }
  0x4f   : > { %v967_v13 = vsel %vm914_vm3, %v965_v25, %v966_v0  ;;  %v975_v45 = vrot.slane %v4740_v44, 2 }
  0x50   : > { %3278 = vmatmul.mubr.msk.bf16.gmra.mrb[8].mxu0 %vm488_vm2, %v4227_v17  ;;  %v4273_v54 = vsel %vm914_vm3, %v916_v61, %v918_v20  ;;  %v4738_v20 = vunpack.c.h.bf16 %v4030_v31  ;;  %v969_v36 = vsel %vm914_vm3, %v966_v0, %v968_v26  ;;  %v4741_v0 = vunpack.c.h.bf16 %v4048_v15 }
  0x51   : > { %3281 = vmatprep.mubr.msk.bf16.mxu0 %vm488_vm2, %v4229_v39  ;;  %v1027_v24 = vpack.c.bf16 %v4273_v54, %v4264_v29  ;;  %v4308_v2 = vpack.c.bf16 %v969_v36, %v967_v13  ;;  %v4742_v26 = vunpack.c.l.bf16 %v4056_v46  ;;  %v237_v54 = vld [vmem:[%s3787_s26 + $0xd4] sm:$0x1] }
  0x52   : > { %v971_v61 = vrot.slane %v4738_v20, 2  ;;  %v976_v18 = vrot.slane %v4741_v0, 2  ;;  %v4747_v0 = vunpack.c.h.bf16 %v4118_v38 }
  0x53   : > { %v978_v4 = vrot.slane %v4742_v26, 2 }
  0x54   : > { %v972_v22 = vsel %vm914_vm3, %v970_v42, %v971_v61  ;;  %v4743_v42 = vunpack.c.l.bf16 %v4099_v11  ;;  %v977_v46 = vsel %vm914_vm3, %v975_v45, %v976_v18  ;;  %v986_v26 = vrot.slane %v4747_v0, 2 }
  0x55   : > { %3128 = vmatmul.mubr.msk.bf16.gmra.mrb[28].mxu1 %vm488_vm2, %v4255_v58  ;;  %v979_v36 = vsel %vm914_vm3, %v976_v18, %v978_v4  ;;  %v4748_v18 = vunpack.c.l.bf16 %v4121_v48 }
  0x56   : > { %3133 = vmatprep.mubr.msk.bf16.mxu1 %vm488_vm2, %v3790_v6  ;;  %v973_v6 = vrot.slane %v4739_v63, 2  ;;  %v980_v20 = vrot.slane %v4743_v42, 2  ;;  %v4749_v42 = vunpack.c.l.bf16 %v4175_v52 }
  0x57   : > { %v988_v4 = vrot.slane %v4748_v18, 2 }
  0x58   : > { %3282 = vmatmul.mubr.msk.bf16.gmra.mrb[12].mxu0 %vm488_vm2, %v4268_v7  ;;  %v974_v59 = vsel %vm914_vm3, %v971_v61, %v973_v6  ;;  %v4744_v61 = vunpack.c.h.bf16 %v4099_v11  ;;  %v4745_v6 = vunpack.c.l.bf16 %v4109_v41 }
  0x59   : > { %3285 = vmatprep.mubr.msk.bf16.mxu0 %vm488_vm2, %v4277_v12  ;;  %v4312_v25 = vpack.c.bf16 %v974_v59, %v972_v22  ;;  %v4338_v22 = vpack.c.bf16 %v979_v36, %v977_v46  ;;  %v4746_v59 = vunpack.c.l.bf16 %v4118_v38  ;;  %v4357_v46 = vld [vmem:[%s3787_s26 + $0xc0] sm:$0xff]   ;;  %v234_v36 = vld [vmem:[%s3787_s26 + $0xc8] sm:$0x1]  ;;  %v989_v48 = vsel %vm914_vm3, %v986_v26, %v988_v4 }
  0x5a   : > { %v981_v63 = vrot.slane %v4744_v61, 2  ;;  %v983_v13 = vrot.slane %v4745_v6, 2  ;;  %v4750_v61 = vunpack.c.h.bf16 %v4175_v52  ;;  %v4751_v6 = vunpack.c.l.bf16 %v4178_v53 }
  0x5b   : > { %v985_v44 = vrot.slane %v4746_v59, 2  ;;  %v287_v59 = vunpack.c.h.bf16 %v4357_v46  ;;  %v288_v0 = vunpack.c.l.bf16 %v234_v36 }
  0x5c   : > { %v984_v41 = vsel %vm914_vm3, %v981_v63, %v983_v13  ;;  %v993_v13 = vrot.slane %v4751_v6, 2 }
  0x5d   : > { %3134 = vmatmul.mubr.msk.bf16.vlgmr.msra.gmra.mrb[0].mxu1 %vm488_vm2, %v3796_v8  ;;  %v1704_v4 = vrot.slane %v287_v59, 2  ;;  %v1497_v36 = vrot.slane %v288_v0, 1 }
  0x5e   : > { %3166 = vmatpush3.bf16.msra.mxu1 %v1094_v40  ;;  %3137 = vmatprep.mubr.msk.bf16.mxu1 %vm488_vm2, %v3806_v14  ;;  %v982_v40 = vsel %vm914_vm3, %v980_v20, %v981_v63  ;;  %v990_v20 = vrot.slane %v4749_v42, 2  ;;  %v991_v63 = vrot.slane %v4750_v61, 2  ;;  %v1706_v61 = vrot.slane %v288_v0, 2 }
  0x5f   : > { %3664 = vmatprep.subr.msk.bf16.mxu1 %vm537_vm0, %v4304_v32  ;;  %v4346_v45 = vpack.c.bf16 %v984_v41, %v982_v40  ;;  %v987_v40 = vsel %vm914_vm3, %v985_v44, %v986_v26  ;;  %v286_v41 = vunpack.c.l.bf16 %v4357_v46  ;;  %v291_v0 = vunpack.c.l.bf16 %v237_v54 }
  0x60   : > { %3286 = vmatmul.mubr.msk.bf16.gmra.mrb[16].mxu0 %vm488_vm2, %v4308_v2  ;;  %v992_v53 = vsel %vm914_vm3, %v990_v20, %v991_v63  ;;  %v994_v18 = vsel %vm914_vm3, %v991_v63, %v993_v13  ;;  %v4372_v42 = vpack.c.bf16 %v989_v48, %v987_v40  ;;  %v1495_v20 = vrot.slane %v287_v59, 1  ;;  %v2925_v59 = vld [vmem:[%s4673_s1 + $0x10] sm:$0x3] }
  0x61   : > { %3289 = vmatprep.mubr.msk.bf16.mxu0 %vm488_vm2, %v4312_v25  ;;  %v4376_v44 = vpack.c.bf16 %v994_v18, %v992_v53  ;;  %v1703_v26 = vrot.slane %v286_v41, 2  ;;  %v1494_v6 = vrot.slane %v286_v41, 1  ;;  %v1707_v13 = vsel %vm914_vm3, %v1704_v4, %v1706_v61 }
  0x62   : > { %v1498_v48 = vsel %vm357_vm1, %v1495_v20, %v1497_v36  ;;  %v2131_v41 = vsel %vm537_vm0, %v4150_v47, 0  ;;  %v1296_v47 = vsel %vm537_vm0, %v4304_v32, 0 }
  0x63   : > { %v1705_v63 = vsel %vm914_vm3, %v1703_v26, %v1704_v4  ;;  %v1496_v40 = vsel %vm357_vm1, %v1494_v6, %v1495_v20  ;;  %v2329_v26 = vrot.slane %v291_v0, 2  ;;  %v2340_v20 = vsel %vm537_vm0, %v2925_v59, 0 }
  0x64   : > { %v4386_v53 = vpack.c.bf16 %v1498_v48, %v1496_v40  ;;  %v4390_v18 = vpack.c.bf16 %v1707_v13, %v1705_v63 }
  0x65   : > { %3138 = vmatmul.mubr.msk.bf16.gmra.mrb[4].mxu1 %vm488_vm2, %v3829_v27 }
  0x66   : > { %3141 = vmatprep.mubr.msk.bf16.mxu1 %vm488_vm2, %v3841_v35 }
  0x68   : > { %3290 = vmatmul.mubr.msk.bf16.gmra.mrb[20].mxu0 %vm488_vm2, %v4338_v22 }
  0x69   : > { %3293 = vmatprep.mubr.msk.bf16.mxu0 %vm488_vm2, %v4346_v45 }
  0x6d   : > { %3142 = vmatmul.mubr.msk.bf16.gmra.mrb[8].mxu1 %vm488_vm2, %v3869_v49 }
  0x6e   : > { %3145 = vmatprep.mubr.msk.bf16.mxu1 %vm488_vm2, %v3879_v55 }
  0x70   : > { %3294 = vmatmul.mubr.msk.bf16.gmra.mrb[24].mxu0 %vm488_vm2, %v4372_v42 }
  0x71   : > { %3297 = vmatprep.mubr.msk.bf16.mxu0 %vm488_vm2, %v4376_v44 }
  0x75   : > { %3146 = vmatmul.mubr.msk.bf16.gmra.mrb[12].mxu1 %vm488_vm2, %v3913_v19 }
  0x76   : > { %3149 = vmatprep.mubr.msk.bf16.mxu1 %vm488_vm2, %v3949_v51 }
  0x78   : > { %3298 = vmatmul.mubr.msk.bf16.gmra.mrb[28].mxu0 %vm488_vm2, %v4390_v18 }
  0x79   : > { %3303 = vmatprep.mubr.msk.bf16.mxu0 %vm488_vm2, %v3806_v14 }
  0x7d   : > { %3150 = vmatmul.mubr.msk.bf16.gmra.mrb[16].mxu1 %vm488_vm2, %v3974_v30 }
  0x7e   : > { %3153 = vmatprep.mubr.msk.bf16.mxu1 %vm488_vm2, %v3992_v50 }
  0x80   : > { %3304 = vmatmul.mubr.msk.bf16.vlgmr.msra.gmra.mrb[0].mxu0 %vm488_vm2, %v3829_v27 }
  0x81   : > { %3336 = vmatpush3.bf16.msra.mxu0 %v2131_v41  ;;  %3307 = vmatprep.mubr.msk.bf16.mxu0 %vm488_vm2, %v3841_v35 }
  0x82   : > { %3670 = vmatprep.subr.msk.bf16.mxu0 %vm537_vm0, %v2925_v59 }
  0x85   : > { %3154 = vmatmul.mubr.msk.bf16.gmra.mrb[20].mxu1 %vm488_vm2, %v4030_v31 }
  0x86   : > { %3157 = vmatprep.mubr.msk.bf16.mxu1 %vm488_vm2, %v4048_v15 }
  0x88   : > { %3308 = vmatmul.mubr.msk.bf16.gmra.mrb[4].mxu0 %vm488_vm2, %v3869_v49 }
  0x89   : > { %3311 = vmatprep.mubr.msk.bf16.mxu0 %vm488_vm2, %v3879_v55 }
  0x8d   : > { %3158 = vmatmul.mubr.msk.bf16.gmra.mrb[24].mxu1 %vm488_vm2, %v4099_v11 }
  0x8e   : > { %3161 = vmatprep.mubr.msk.bf16.mxu1 %vm488_vm2, %v4118_v38 }
  0x90   : > { %3312 = vmatmul.mubr.msk.bf16.gmra.mrb[8].mxu0 %vm488_vm2, %v3913_v19 }
  0x91   : > { %3315 = vmatprep.mubr.msk.bf16.mxu0 %vm488_vm2, %v3949_v51 }
  0x95   : > { %3162 = vmatmul.mubr.msk.bf16.gmra.mrb[28].mxu1 %vm488_vm2, %v4175_v52 }
  0x96   : > { %3167 = vmatprep.mubr.msk.bf16.mxu1 %vm488_vm2, %v1027_v24 }
  0x98   : > { %3316 = vmatmul.mubr.msk.bf16.gmra.mrb[12].mxu0 %vm488_vm2, %v3974_v30 }
  0x99   : > { %3319 = vmatprep.mubr.msk.bf16.mxu0 %vm488_vm2, %v3992_v50 }
  0x9d   : > { %3168 = vmatmul.mubr.msk.bf16.vlgmr.msra.gmra.mrb[0].mxu1 %vm488_vm2, %v4039_v9 }
  0x9e   : > { %3200 = vmatpush3.bf16.msra.mxu1 %v1296_v47  ;;  %3171 = vmatprep.mubr.msk.bf16.mxu1 %vm488_vm2, %v4087_v37 }
  0x9f   : > { %3666 = vmatprep.subr.msk.bf16.mxu1 %vm537_vm0, %v3760_v1  ;;  %v235_v1 = vld [vmem:[%s3787_s26 + $0xcc] sm:$0xff]  }
  0xa0   : > { %3320 = vmatmul.mubr.msk.bf16.gmra.mrb[16].mxu0 %vm488_vm2, %v4030_v31  ;;  %v289_v9 = vunpack.c.l.bf16 %v235_v1  ;;  %v290_v29 = vunpack.c.h.bf16 %v235_v1 }
  0xa1   : > { %3323 = vmatprep.mubr.msk.bf16.mxu0 %vm488_vm2, %v4048_v15 }
  0xa2   : > { %v2326_v24 = vrot.slane %v289_v9, 2  ;;  %v2327_v32 = vrot.slane %v290_v29, 2 }
  0xa4   : > { %v4471_v4 = vsel %vm914_vm3, %v2326_v24, %v2327_v32  ;;  %v4476_v61 = vsel %vm914_vm3, %v2327_v32, %v2329_v26 }
  0xa5   : > { %3172 = vmatmul.mubr.msk.bf16.gmra.mrb[4].mxu1 %vm488_vm2, %v4135_v62  ;;  %v2333_v6 = vpack.c.bf16 %v4476_v61, %v4471_v4 }
  0xa6   : > { %3175 = vmatprep.mubr.msk.bf16.mxu1 %vm488_vm2, %v4166_v33 }
  0xa8   : > { %3324 = vmatmul.mubr.msk.bf16.gmra.mrb[20].mxu0 %vm488_vm2, %v4099_v11 }
  0xa9   : > { %3327 = vmatprep.mubr.msk.bf16.mxu0 %vm488_vm2, %v4118_v38 }
  0xad   : > { %3176 = vmatmul.mubr.msk.bf16.gmra.mrb[8].mxu1 %vm488_vm2, %v4182_v23 }
  0xae   : > { %3179 = vmatprep.mubr.msk.bf16.mxu1 %vm488_vm2, %v4227_v17 }
  0xb0   : > { %3328 = vmatmul.mubr.msk.bf16.gmra.mrb[24].mxu0 %vm488_vm2, %v4175_v52 }
  0xb1   : > { %3331 = vmatprep.mubr.msk.bf16.mxu0 %vm488_vm2, %v4357_v46 }
  0xb5   : > { %3180 = vmatmul.mubr.msk.bf16.gmra.mrb[12].mxu1 %vm488_vm2, %v4229_v39 }
  0xb6   : > { %3183 = vmatprep.mubr.msk.bf16.mxu1 %vm488_vm2, %v4268_v7 }
  0xb8   : > { %3332 = vmatmul.mubr.msk.bf16.gmra.mrb[28].mxu0 %vm488_vm2, %v235_v1 }
  0xb9   : > { %3337 = vmatprep.mubr.msk.bf16.mxu0 %vm488_vm2, %v3881_v56  ;;  %v4753_v56 = vld [vmem:[#allocation3_spill] sm:$0xff] }
  0xbd   : > { %3184 = vmatmul.mubr.msk.bf16.gmra.mrb[16].mxu1 %vm488_vm2, %v4277_v12 }
  0xbe   : > { %3187 = vmatprep.mubr.msk.bf16.mxu1 %vm488_vm2, %v4308_v2 }
  0xc0   : > { %3338 = vmatmul.mubr.msk.bf16.vlgmr.msra.gmra.mrb[0].mxu0 %vm488_vm2, %v3915_v21  ;;  %v2120_v21 = vrot.slane %v291_v0, 1 }
  0xc1   : > { %3370 = vmatpush3.bf16.msra.mxu0 %v2340_v20  ;;  %3341 = vmatprep.mubr.msk.bf16.mxu0 %vm488_vm2, %v3924_v28 }
  0xc5   : > { %3188 = vmatmul.mubr.msk.bf16.gmra.mrb[20].mxu1 %vm488_vm2, %v4312_v25 }
  0xc6   : > { %3191 = vmatprep.mubr.msk.bf16.mxu1 %vm488_vm2, %v4338_v22 }
  0xc8   : > { %3342 = vmatmul.mubr.msk.bf16.gmra.mrb[4].mxu0 %vm488_vm2, %v3953_v57 }
  0xc9   : > { %3345 = vmatprep.mubr.msk.bf16.mxu0 %vm488_vm2, %v3987_v10  ;;  %v4752_v10 = vld [vmem:[#allocation2_spill] sm:$0xff] }
  0xcd   : > { %3192 = vmatmul.mubr.msk.bf16.gmra.mrb[24].mxu1 %vm488_vm2, %v4346_v45 }
  0xce   : > { %3195 = vmatprep.mubr.msk.bf16.mxu1 %vm488_vm2, %v4372_v42 }
  0xd0   : > { %3346 = vmatmul.mubr.msk.bf16.gmra.mrb[8].mxu0 %vm488_vm2, %v4007_v60 }
  0xd1   : > { %3349 = vmatprep.mubr.msk.bf16.mxu0 %vm488_vm2, %v4050_v16 }
  0xd5   : > { %3196 = vmatmul.mubr.msk.bf16.gmra.mrb[28].mxu1 %vm488_vm2, %v4376_v44 }
  0xd6   : > { %3201 = vmatprep.mubr.msk.bf16.mxu1 %vm488_vm2, %v3796_v8  ;;  %v4754_v8 = vld [vmem:[#allocation4_spill] sm:$0xff] }
  0xd8   : > { %3350 = vmatmul.mubr.msk.bf16.gmra.mrb[12].mxu0 %vm488_vm2, %v4085_v43 }
  0xd9   : > { %3353 = vmatprep.mubr.msk.bf16.mxu0 %vm488_vm2, %v4091_v34 }
  0xdd   : > { %3202 = vmatmul.mubr.msk.bf16.vlgmr.msra.gmra.mrb[0].mxu1 %vm488_vm2, %v3806_v14  ;;  %v2117_v14 = vrot.slane %v289_v9, 1 }
  0xde   : > { %3404 = vmatpush3.bf16.msra.mxu1 %v4752_v10  ;;  %3205 = vmatprep.mubr.msk.bf16.mxu1 %vm488_vm2, %v3829_v27  ;;  %v2118_v27 = vrot.slane %v290_v29, 1 }
  0xe0   : > { %3354 = vmatmul.mubr.msk.bf16.gmra.mrb[16].mxu0 %vm488_vm2, %v4753_v56 }
  0xe1   : > { %3357 = vmatprep.mubr.msk.bf16.mxu0 %vm488_vm2, %v4162_v5 }
  0xe5   : > { %3206 = vmatmul.mubr.msk.bf16.gmra.mrb[4].mxu1 %vm488_vm2, %v3841_v35  ;;  %v2119_v35 = vsel %vm357_vm1, %v2117_v14, %v2118_v27 }
  0xe6   : > { %3209 = vmatprep.mubr.msk.bf16.mxu1 %vm488_vm2, %v3869_v49  ;;  %v2121_v49 = vsel %vm357_vm1, %v2118_v27, %v2120_v21 }
  0xe8   : > { %3358 = vmatmul.mubr.msk.bf16.gmra.mrb[20].mxu0 %vm488_vm2, %v4210_v3 }
  0xe9   : > { %3361 = vmatprep.mubr.msk.bf16.mxu0 %vm488_vm2, %v4754_v8 }
  0xed   : > { %3210 = vmatmul.mubr.msk.bf16.gmra.mrb[8].mxu1 %vm488_vm2, %v3879_v55  ;;  %v2124_v55 = vpack.c.bf16 %v2121_v49, %v2119_v35 }
  0xee   : > { %3213 = vmatprep.mubr.msk.bf16.mxu1 %vm488_vm2, %v3913_v19 }
  0xf0   : > { %3362 = vmatmul.mubr.msk.bf16.gmra.mrb[24].mxu0 %vm488_vm2, %v4255_v58 }
  0xf1   : > { %3365 = vmatprep.mubr.msk.bf16.mxu0 %vm488_vm2, %v4386_v53 }
  0xf5   : > { %3214 = vmatmul.mubr.msk.bf16.gmra.mrb[12].mxu1 %vm488_vm2, %v3949_v51 }
  0xf6   : > { %3217 = vmatprep.mubr.msk.bf16.mxu1 %vm488_vm2, %v3974_v30 }
  0xf8   : > { %3366 = vmatmul.mubr.msk.bf16.gmra.mrb[28].mxu0 %vm488_vm2, %v2124_v55 }
  0xf9   : > { %3371 = vmatprep.mubr.msk.bf16.mxu0 %vm488_vm2, %v4087_v37 }
  0xfd   : > { %3218 = vmatmul.mubr.msk.bf16.gmra.mrb[16].mxu1 %vm488_vm2, %v3992_v50 }
  0xfe   : > { %3221 = vmatprep.mubr.msk.bf16.mxu1 %vm488_vm2, %v4030_v31 }
 0x100   : > { %3372 = vmatmul.mubr.msk.bf16.vlgmr.msra.gmra.mrb[0].mxu0 %vm488_vm2, %v4135_v62 }
 0x101   : > { %3375 = vmatprep.mubr.msk.bf16.mxu0 %vm488_vm2, %v4166_v33 }
 0x105   : > { %3222 = vmatmul.mubr.msk.bf16.gmra.mrb[20].mxu1 %vm488_vm2, %v4048_v15 }
 0x106   : > { %3225 = vmatprep.mubr.msk.bf16.mxu1 %vm488_vm2, %v4099_v11 }
 0x108   : > { %3376 = vmatmul.mubr.msk.bf16.gmra.mrb[4].mxu0 %vm488_vm2, %v4182_v23 }
 0x109   : > { %3379 = vmatprep.mubr.msk.bf16.mxu0 %vm488_vm2, %v4227_v17 }
 0x10d   : > { %3226 = vmatmul.mubr.msk.bf16.gmra.mrb[24].mxu1 %vm488_vm2, %v4118_v38 }
 0x10e   : > { %3229 = vmatprep.mubr.msk.bf16.mxu1 %vm488_vm2, %v4175_v52 }
 0x110   : > { %3380 = vmatmul.mubr.msk.bf16.gmra.mrb[8].mxu0 %vm488_vm2, %v4229_v39 }
 0x111   : > { %3383 = vmatprep.mubr.msk.bf16.mxu0 %vm488_vm2, %v4268_v7 }
 0x115   : > { %3230 = vmatmul.mubr.msk.bf16.gmra.mrb[28].mxu1 %vm488_vm2, %v4357_v46 }
 0x116   : > { %3251 = vmatprep.mubr.msk.bf16.mxu1 %vm488_vm2, %v4085_v43 }
 0x118   : > { %3384 = vmatmul.mubr.msk.bf16.gmra.mrb[12].mxu0 %vm488_vm2, %v4277_v12 }
 0x119   : > { %3387 = vmatprep.mubr.msk.bf16.mxu0 %vm488_vm2, %v4308_v2 }
 0x11d   : > { %3252 = vmatmul.mubr.msk.bf16.vlgmr.msra.gmra.mrb[16].mxu1 %vm488_vm2, %v4091_v34 }
 0x11e   : > { %3255 = vmatprep.mubr.msk.bf16.mxu1 %vm488_vm2, %v4753_v56 }
 0x120   : > { %3388 = vmatmul.mubr.msk.bf16.gmra.mrb[16].mxu0 %vm488_vm2, %v4312_v25 }
 0x121   : > { %3391 = vmatprep.mubr.msk.bf16.mxu0 %vm488_vm2, %v4338_v22 }
 0x125   : > { %3256 = vmatmul.mubr.msk.bf16.gmra.mrb[20].mxu1 %vm488_vm2, %v4162_v5 }
 0x126   : > { %3259 = vmatprep.mubr.msk.bf16.mxu1 %vm488_vm2, %v4210_v3 }
 0x128   : > { %3392 = vmatmul.mubr.msk.bf16.gmra.mrb[20].mxu0 %vm488_vm2, %v4346_v45 }
 0x129   : > { %3395 = vmatprep.mubr.msk.bf16.mxu0 %vm488_vm2, %v4372_v42 }
 0x12d   : > { %3260 = vmatmul.mubr.msk.bf16.gmra.mrb[24].mxu1 %vm488_vm2, %v4754_v8 }
 0x12e   : > { %3263 = vmatprep.mubr.msk.bf16.mxu1 %vm488_vm2, %v4255_v58 }
 0x130   : > { %3396 = vmatmul.mubr.msk.bf16.gmra.mrb[24].mxu0 %vm488_vm2, %v4376_v44 }
 0x131   : > { %3399 = vmatprep.mubr.msk.bf16.mxu0 %vm488_vm2, %v4390_v18 }
 0x135   : > { %3264 = vmatmul.mubr.msk.bf16.gmra.mrb[28].mxu1 %vm488_vm2, %v4386_v53 }
 0x138   : > { %3400 = vmatmul.mubr.msk.bf16.gmra.mrb[28].mxu0 %vm488_vm2, %v2333_v6 }
 0x1b0   : > { %v3203_v19 = vpop.f32.mrb[0].mxu1 }
 0x1b1   : > { %v1332_v28 = vpop.f32.mrb[1].mxu1 }
 0x1b2   : > { %v3204_v50 = vpop.f32.mrb[2].mxu1 }
 0x1b3   : > { %v1335_v51 = vpop.f32.mrb[3].mxu1 }
 0x1b8   : > { %v3207_v57 = vpop.f32.mrb[4].mxu1 }
 0x1b9   : > { %v1348_v30 = vpop.f32.mrb[5].mxu1 }
 0x1ba   : > { %v3208_v16 = vpop.f32.mrb[6].mxu1 }
 0x1bb   : > { %v1351_v60 = vpop.f32.mrb[7].mxu1 }
 0x1c0   : > { %v3211_v31 = vpop.f32.mrb[8].mxu1 }
 0x1c1   : > { %v1364_v15 = vpop.f32.mrb[9].mxu1 }
 0x1c2   : > { %v3212_v11 = vpop.f32.mrb[10].mxu1 }
 0x1c3   : > { %v4612_v43 = vpop.f32.mrb[11].mxu1 }
 0x1c8   : > { %v4615_v37 = vpop.f32.mrb[12].mxu1 }
 0x1c9   : > { %v4617_v34 = vpop.f32.mrb[13].mxu1 }
 0x1ca   : > { %v4619_v38 = vpop.f32.mrb[14].mxu1 }
 0x1cb   : > { %v4621_v62 = vpop.f32.mrb[15].mxu1 }
 0x1d3   : > { %v3373_v5 = vpop.f32.mrb[0].mxu0 }
 0x1d4   : > { %v3405_v33 = vadd.f32 %v3373_v5, %v3203_v19  ;;  %v2376_v52 = vpop.f32.mrb[1].mxu0 }
 0x1d5   : > { %v3406_v23 = vadd.f32 %v2376_v52, %v1332_v28  ;;  %v3374_v3 = vpop.f32.mrb[2].mxu0 }
 0x1d6   : > { %2537 = vst [vmem:[%s4626_s16 + $0x10] sm:$0xff] %v3405_v33  ;;  %v3407_v17 = vadd.f32 %v3374_v3, %v3204_v50  ;;  %v2379_v39 = vpop.f32.mrb[3].mxu0  ;;  %v2606_v25 = vmul.f32 %v3405_v33, %v3405_v33 }
 0x1d7   : > { %2535 = vst [vmem:[%s4626_s16] sm:$0xff] %v3406_v23  ;;  %v3408_v58 = vadd.f32 %v2379_v39, %v1335_v51  ;;  %v2604_v7 = vmul.f32 %v3406_v23, %v3406_v23 }
 0x1d8   : > { %2538 = vst [vmem:[%s4626_s16 + $0x18] sm:$0xff] %v3407_v17  ;;  %v2607_v36 = vmul.f32 %v3407_v17, %v3407_v17 }
 0x1d9   : > { %2536 = vst [vmem:[%s4626_s16 + $0x8] sm:$0xff] %v3408_v58  ;;  %v2567_v12 = vadd.f32 %v3408_v58, %v3406_v23  ;;  %v2605_v2 = vmul.f32 %v3408_v58, %v3408_v58 }
 0x1db   : > { %v2568_v22 = vadd.f32 %v3405_v33, %v2567_v12  ;;  %v2636_v45 = vadd.f32 %v2605_v2, %v2604_v7  ;;  %v3377_v46 = vpop.f32.mrb[4].mxu0 }
 0x1dc   : > { %v3409_v42 = vadd.f32 %v3377_v46, %v3207_v57  ;;  %v2392_v44 = vpop.f32.mrb[5].mxu0 }
 0x1dd   : > { %v2637_v63 = vadd.f32 %v2636_v45, %v2606_v25  ;;  %v3410_v13 = vadd.f32 %v2392_v44, %v1348_v30  ;;  %v2569_v40 = vadd.f32 %v3407_v17, %v2568_v22  ;;  %v3378_v48 = vpop.f32.mrb[6].mxu0 }
 0x1de   : > { %2541 = vst [vmem:[%s4626_s16 + $0x30] sm:$0xff] %v3409_v42  ;;  %v3411_v53 = vadd.f32 %v3378_v48, %v3208_v16  ;;  %v2395_v18 = vpop.f32.mrb[7].mxu0  ;;  %v2610_v24 = vmul.f32 %v3409_v42, %v3409_v42 }
 0x1df   : > { %2539 = vst [vmem:[%s4626_s16 + $0x20] sm:$0xff] %v3410_v13  ;;  %v2570_v41 = vadd.f32 %v3410_v13, %v2569_v40  ;;  %v2608_v59 = vmul.f32 %v3410_v13, %v3410_v13  ;;  %v2638_v47 = vadd.f32 %v2637_v63, %v2607_v36  ;;  %v3412_v1 = vadd.f32 %v2395_v18, %v1351_v60 }
 0x1e0   : > { %2542 = vst [vmem:[%s4626_s16 + $0x38] sm:$0xff] %v3411_v53  ;;  %v2611_v6 = vmul.f32 %v3411_v53, %v3411_v53 }
 0x1e1   : > { %v2639_v9 = vadd.f32 %v2638_v47, %v2608_v59  ;;  %2540 = vst [vmem:[%s4626_s16 + $0x28] sm:$0xff] %v3412_v1  ;;  %v2571_v29 = vadd.f32 %v3412_v1, %v2570_v41  ;;  %v2609_v54 = vmul.f32 %v3412_v1, %v3412_v1 }
 0x1e3   : > { %v2572_v32 = vadd.f32 %v3409_v42, %v2571_v29  ;;  %v2640_v0 = vadd.f32 %v2639_v9, %v2609_v54  ;;  %v3381_v26 = vpop.f32.mrb[8].mxu0 }
 0x1e4   : > { %v3413_v4 = vadd.f32 %v3381_v26, %v3211_v31  ;;  %v2408_v61 = vpop.f32.mrb[9].mxu0 }
 0x1e5   : > { %v2641_v20 = vadd.f32 %v2640_v0, %v2610_v24  ;;  %v3414_v10 = vadd.f32 %v2408_v61, %v1364_v15  ;;  %v2573_v56 = vadd.f32 %v3411_v53, %v2572_v32  ;;  %v3382_v8 = vpop.f32.mrb[10].mxu0 }
 0x1e6   : > { %2545 = vst [vmem:[%s4626_s16 + $0x50] sm:$0xff] %v3413_v4  ;;  %v3415_v14 = vadd.f32 %v3382_v8, %v3212_v11  ;;  %v2411_v27 = vpop.f32.mrb[11].mxu0  ;;  %v2614_v51 = vmul.f32 %v3413_v4, %v3413_v4 }
 0x1e7   : > { %2543 = vst [vmem:[%s4626_s16 + $0x40] sm:$0xff] %v3414_v10  ;;  %v2574_v21 = vadd.f32 %v3414_v10, %v2573_v56  ;;  %v2612_v35 = vmul.f32 %v3414_v10, %v3414_v10  ;;  %v2642_v49 = vadd.f32 %v2641_v20, %v2611_v6  ;;  %v3416_v55 = vadd.f32 %v2411_v27, %v4612_v43 }
 0x1e8   : > { %2546 = vst [vmem:[%s4626_s16 + $0x58] sm:$0xff] %v3415_v14  ;;  %v2615_v15 = vmul.f32 %v3415_v14, %v3415_v14 }
 0x1e9   : > { %v2643_v19 = vadd.f32 %v2642_v49, %v2612_v35  ;;  %2544 = vst [vmem:[%s4626_s16 + $0x48] sm:$0xff] %v3416_v55  ;;  %v2575_v28 = vadd.f32 %v3416_v55, %v2574_v21  ;;  %v2613_v50 = vmul.f32 %v3416_v55, %v3416_v55 }
 0x1eb   : > { %v2576_v57 = vadd.f32 %v3413_v4, %v2575_v28  ;;  %v2644_v30 = vadd.f32 %v2643_v19, %v2613_v50  ;;  %v3385_v16 = vpop.f32.mrb[12].mxu0 }
 0x1ec   : > { %v3417_v60 = vadd.f32 %v3385_v16, %v4615_v37  ;;  %v2424_v31 = vpop.f32.mrb[13].mxu0 }
 0x1ed   : > { %v2645_v11 = vadd.f32 %v2644_v30, %v2614_v51  ;;  %v3418_v43 = vadd.f32 %v2424_v31, %v4617_v34  ;;  %v2577_v5 = vadd.f32 %v3415_v14, %v2576_v57  ;;  %v3386_v33 = vpop.f32.mrb[14].mxu0 }
 0x1ee   : > { %2549 = vst [vmem:[%s4626_s16 + $0x70] sm:$0xff] %v3417_v60  ;;  %v3419_v52 = vadd.f32 %v3386_v33, %v4619_v38  ;;  %v2427_v23 = vpop.f32.mrb[15].mxu0  ;;  %v2618_v45 = vmul.f32 %v3417_v60, %v3417_v60 }
 0x1ef   : > { %2547 = vst [vmem:[%s4626_s16 + $0x60] sm:$0xff] %v3418_v43  ;;  %v2578_v3 = vadd.f32 %v3418_v43, %v2577_v5  ;;  %v2616_v17 = vmul.f32 %v3418_v43, %v3418_v43  ;;  %v2646_v39 = vadd.f32 %v2645_v11, %v2615_v15  ;;  %v3420_v58 = vadd.f32 %v2427_v23, %v4621_v62 }
 0x1f0   : > { %v3253_v37 = vpop.f32.mrb[16].mxu1  ;;  %2550 = vst [vmem:[%s4626_s16 + $0x78] sm:$0xff] %v3419_v52  ;;  %v2619_v63 = vmul.f32 %v3419_v52, %v3419_v52 }
 0x1f1   : > { %v1608_v7 = vpop.f32.mrb[17].mxu1  ;;  %v2647_v12 = vadd.f32 %v2646_v39, %v2616_v17  ;;  %2548 = vst [vmem:[%s4626_s16 + $0x68] sm:$0xff] %v3420_v58  ;;  %v2579_v2 = vadd.f32 %v3420_v58, %v2578_v3  ;;  %v2617_v34 = vmul.f32 %v3420_v58, %v3420_v58 }
 0x1f2   : > { %v3254_v25 = vpop.f32.mrb[18].mxu1 }
 0x1f3   : > { %v1611_v22 = vpop.f32.mrb[19].mxu1  ;;  %v2580_v38 = vadd.f32 %v3417_v60, %v2579_v2  ;;  %v2648_v46 = vadd.f32 %v2647_v12, %v2617_v34  ;;  %v3389_v42 = vpop.f32.mrb[16].mxu0 }
 0x1f4   : > { %v3421_v44 = vadd.f32 %v3389_v42, %v3253_v37  ;;  %v2440_v36 = vpop.f32.mrb[17].mxu0 }
 0x1f5   : > { %v2649_v62 = vadd.f32 %v2648_v46, %v2618_v45  ;;  %v3422_v13 = vadd.f32 %v2440_v36, %v1608_v7  ;;  %v2581_v40 = vadd.f32 %v3419_v52, %v2580_v38  ;;  %v3390_v48 = vpop.f32.mrb[18].mxu0 }
 0x1f6   : > { %2553 = vst [vmem:[%s4626_s16 + $0x90] sm:$0xff] %v3421_v44  ;;  %v3423_v53 = vadd.f32 %v3390_v48, %v3254_v25  ;;  %v2443_v18 = vpop.f32.mrb[19].mxu0  ;;  %v2622_v4 = vmul.f32 %v3421_v44, %v3421_v44 }
 0x1f7   : > { %2551 = vst [vmem:[%s4626_s16 + $0x80] sm:$0xff] %v3422_v13  ;;  %v2582_v41 = vadd.f32 %v3422_v13, %v2581_v40  ;;  %v2620_v59 = vmul.f32 %v3422_v13, %v3422_v13  ;;  %v2650_v47 = vadd.f32 %v2649_v62, %v2619_v63  ;;  %v3424_v1 = vadd.f32 %v2443_v18, %v1611_v22 }
 0x1f8   : > { %v3257_v9 = vpop.f32.mrb[20].mxu1  ;;  %2554 = vst [vmem:[%s4626_s16 + $0x98] sm:$0xff] %v3423_v53  ;;  %v2623_v8 = vmul.f32 %v3423_v53, %v3423_v53 }
 0x1f9   : > { %v1624_v29 = vpop.f32.mrb[21].mxu1  ;;  %v2651_v54 = vadd.f32 %v2650_v47, %v2620_v59  ;;  %2552 = vst [vmem:[%s4626_s16 + $0x88] sm:$0xff] %v3424_v1  ;;  %v2583_v24 = vadd.f32 %v3424_v1, %v2582_v41  ;;  %v2621_v32 = vmul.f32 %v3424_v1, %v3424_v1 }
 0x1fa   : > { %v3258_v0 = vpop.f32.mrb[22].mxu1 }
 0x1fb   : > { %v1627_v26 = vpop.f32.mrb[23].mxu1  ;;  %v2584_v61 = vadd.f32 %v3421_v44, %v2583_v24  ;;  %v2652_v6 = vadd.f32 %v2651_v54, %v2621_v32  ;;  %v3393_v20 = vpop.f32.mrb[20].mxu0 }
 0x1fc   : > { %v3425_v10 = vadd.f32 %v3393_v20, %v3257_v9  ;;  %v2456_v56 = vpop.f32.mrb[21].mxu0 }
 0x1fd   : > { %v2653_v14 = vadd.f32 %v2652_v6, %v2622_v4  ;;  %v3426_v27 = vadd.f32 %v2456_v56, %v1624_v29  ;;  %v2585_v21 = vadd.f32 %v3423_v53, %v2584_v61  ;;  %v3394_v35 = vpop.f32.mrb[22].mxu0 }
 0x1fe   : > { %2557 = vst [vmem:[%s4626_s16 + $0xb0] sm:$0xff] %v3425_v10  ;;  %v3427_v49 = vadd.f32 %v3394_v35, %v3258_v0  ;;  %v2459_v55 = vpop.f32.mrb[23].mxu0  ;;  %v2626_v43 = vmul.f32 %v3425_v10, %v3425_v10 }
 0x1ff   : > { %2555 = vst [vmem:[%s4626_s16 + $0xa0] sm:$0xff] %v3426_v27  ;;  %v2586_v19 = vadd.f32 %v3426_v27, %v2585_v21  ;;  %v2624_v28 = vmul.f32 %v3426_v27, %v3426_v27  ;;  %v2654_v50 = vadd.f32 %v2653_v14, %v2623_v8  ;;  %v3428_v51 = vadd.f32 %v2459_v55, %v1627_v26 }
 0x200   : > { %v3261_v57 = vpop.f32.mrb[24].mxu1  ;;  %2558 = vst [vmem:[%s4626_s16 + $0xb8] sm:$0xff] %v3427_v49  ;;  %v2627_v17 = vmul.f32 %v3427_v49, %v3427_v49 }
 0x201   : > { %v1640_v30 = vpop.f32.mrb[25].mxu1  ;;  %v2655_v16 = vadd.f32 %v2654_v50, %v2624_v28  ;;  %2556 = vst [vmem:[%s4626_s16 + $0xa8] sm:$0xff] %v3428_v51  ;;  %v2587_v60 = vadd.f32 %v3428_v51, %v2586_v19  ;;  %v2625_v31 = vmul.f32 %v3428_v51, %v3428_v51 }
 0x202   : > { %v3262_v15 = vpop.f32.mrb[26].mxu1 }
 0x203   : > { %v1643_v11 = vpop.f32.mrb[27].mxu1  ;;  %v2588_v5 = vadd.f32 %v3425_v10, %v2587_v60  ;;  %v2656_v33 = vadd.f32 %v2655_v16, %v2625_v31  ;;  %v3397_v52 = vpop.f32.mrb[24].mxu0 }
 0x204   : > { %v3429_v23 = vadd.f32 %v3397_v52, %v3261_v57  ;;  %v2472_v3 = vpop.f32.mrb[25].mxu0 }
 0x205   : > { %v2657_v39 = vadd.f32 %v2656_v33, %v2626_v43  ;;  %v3430_v58 = vadd.f32 %v2472_v3, %v1640_v30  ;;  %v2589_v37 = vadd.f32 %v3427_v49, %v2588_v5  ;;  %v3398_v7 = vpop.f32.mrb[26].mxu0 }
 0x206   : > { %2561 = vst [vmem:[%s4626_s16 + $0xd0] sm:$0xff] %v3429_v23  ;;  %v3431_v12 = vadd.f32 %v3398_v7, %v3262_v15  ;;  %v2475_v2 = vpop.f32.mrb[27].mxu0  ;;  %v2630_v13 = vmul.f32 %v3429_v23, %v3429_v23 }
 0x207   : > { %2559 = vst [vmem:[%s4626_s16 + $0xc0] sm:$0xff] %v3430_v58  ;;  %v2590_v34 = vadd.f32 %v3430_v58, %v2589_v37  ;;  %v2628_v25 = vmul.f32 %v3430_v58, %v3430_v58  ;;  %v2658_v22 = vadd.f32 %v2657_v39, %v2627_v17  ;;  %v3432_v45 = vadd.f32 %v2475_v2, %v1643_v11 }
 0x208   : > { %v3265_v38 = vpop.f32.mrb[28].mxu1  ;;  %2562 = vst [vmem:[%s4626_s16 + $0xd8] sm:$0xff] %v3431_v12  ;;  %v2631_v59 = vmul.f32 %v3431_v12, %v3431_v12 }
 0x209   : > { %v1656_v46 = vpop.f32.mrb[29].mxu1  ;;  %v2659_v42 = vadd.f32 %v2658_v22, %v2628_v25  ;;  %2560 = vst [vmem:[%s4626_s16 + $0xc8] sm:$0xff] %v3432_v45  ;;  %v2591_v44 = vadd.f32 %v3432_v45, %v2590_v34  ;;  %v2629_v36 = vmul.f32 %v3432_v45, %v3432_v45 }
 0x20a   : > { %v3266_v63 = vpop.f32.mrb[30].mxu1 }
 0x20b   : > { %v1659_v62 = vpop.f32.mrb[31].mxu1  ;;  %v2592_v40 = vadd.f32 %v3429_v23, %v2591_v44  ;;  %v2660_v48 = vadd.f32 %v2659_v42, %v2629_v36  ;;  %v3401_v53 = vpop.f32.mrb[28].mxu0 }
 0x20c   : > { %v3433_v18 = vadd.f32 %v3401_v53, %v3265_v38  ;;  %v2488_v41 = vpop.f32.mrb[29].mxu0 }
 0x20d   : > { %v2661_v47 = vadd.f32 %v2660_v48, %v2630_v13  ;;  %v3434_v1 = vadd.f32 %v2488_v41, %v1656_v46  ;;  %v2593_v9 = vadd.f32 %v3431_v12, %v2592_v40  ;;  %v3402_v29 = vpop.f32.mrb[30].mxu0 }
 0x20e   : > { %2565 = vst [vmem:[%s4626_s16 + $0xf0] sm:$0xff] %v3433_v18  ;;  %v3435_v54 = vadd.f32 %v3402_v29, %v3266_v63  ;;  %v2491_v24 = vpop.f32.mrb[31].mxu0  ;;  %v2634_v10 = vmul.f32 %v3433_v18, %v3433_v18 }
 0x20f   : > { %2563 = vst [vmem:[%s4626_s16 + $0xe0] sm:$0xff] %v3434_v1  ;;  %v2594_v32 = vadd.f32 %v3434_v1, %v2593_v9  ;;  %v2632_v0 = vmul.f32 %v3434_v1, %v3434_v1  ;;  %v2662_v26 = vadd.f32 %v2661_v47, %v2631_v59  ;;  %v3436_v4 = vadd.f32 %v2491_v24, %v1659_v62 }
 0x210   : > { %2566 = vst [vmem:[%s4626_s16 + $0xf8] sm:$0xff] %v3435_v54  ;;  %v2635_v14 = vmul.f32 %v3435_v54, %v3435_v54 }
 0x211   : > { %v2663_v61 = vadd.f32 %v2662_v26, %v2632_v0  ;;  %2564 = vst [vmem:[%s4626_s16 + $0xe8] sm:$0xff] %v3436_v4  ;;  %v2595_v6 = vadd.f32 %v3436_v4, %v2594_v32  ;;  %v2633_v20 = vmul.f32 %v3436_v4, %v3436_v4 }
 0x213   : > { %v2596_v56 = vadd.f32 %v3433_v18, %v2595_v6  ;;  %v2664_v8 = vadd.f32 %v2663_v61, %v2633_v20 }
 0x215   : > { %v2597_v27 = vadd.f32 %v3435_v54, %v2596_v56  ;;  %v2665_v21 = vadd.f32 %v2664_v8, %v2634_v10 }
 0x217   : > { %v2598_v35 = vrot.slane %v2597_v27, 4  ;;  %v2666_v49 = vadd.f32 %v2665_v21, %v2635_v14 }
 0x219   : > { %v2599_v55 = vadd.f32 %v2598_v35, %v2597_v27  ;;  %v2667_v19 = vrot.slane %v2666_v49, 4 }
 0x21b   : > { %v2600_v28 = vrot.slane %v2599_v55, 2  ;;  %v2668_v50 = vadd.f32 %v2667_v19, %v2666_v49 }
 0x21d   : > { %v2601_v51 = vadd.f32 %v2600_v28, %v2599_v55  ;;  %v2669_v57 = vrot.slane %v2668_v50, 2 }
 0x21f   : > { %v2602_v30 = vrot.slane %v2601_v51, 1  ;;  %v2670_v16 = vadd.f32 %v2669_v57, %v2668_v50 }
 0x221   : > { %v2671_v60 = vrot.slane %v2670_v16, 1  ;;  %v2603_v31 = vadd.f32 %v2602_v30, %v2601_v51 }
 0x223   : > { %v2672_v15 = vadd.f32 %v2671_v60, %v2670_v16 }
 0x225   : > { %v2674_v11 = vsel %vm2673_vm4, %v2603_v31, %v2672_v15 }
 0x226   : > { %2675 = vst [vmem:[%s182_s19] sm:$0x3] %v2674_v11 }
 0x227 PF: > { %s14_s12 = sadd.s32 1, %s3722_s12  }
 0x228   : > { %p11_p5 = scmp.ge.s32.totalorder %s14_s12, 4  }
 0x22a   :  { %13 = sbr.rel (!%p11_p5) target bundleno = 1 (0x1), region = 78 }

</bundles_post_ra>
